<compile_context>
chip_gen: v7x
topology: tpu7x:2x2x1
jax: 0.10.0
libtpu: 0.0.40
codegen_flags: <defaults>
</compile_context>

<pallas_src>
import jax
import jax.numpy as jnp
from jax.experimental import pallas as pl
from jax.experimental.pallas import tpu as pltpu


def _round_up(n, m):
    return ((n + m - 1) // m) * m


def _largest_aligned_divisor(n, cap, align):
    """Largest d with d | n, d <= cap, d % align == 0 (n must be a multiple of align)."""
    cap = max(align, min(cap, n))
    best = align
    d = align
    while d <= cap:
        if n % d == 0:
            best = d
        d += align
    return best


def _gelu_tanh_f32(x):
    # tanh-approximate GELU (matches torch.nn.GELU(approximate='tanh')),
    # computed in float32 so the tanh runs on the EUP at full precision.
    c = jnp.float32(0.7978845608028654)  # sqrt(2/pi)
    return 0.5 * x * (1.0 + jnp.tanh(c * (x + jnp.float32(0.044715) * x * x * x)))


def _vmem_capacity_bytes():
    try:
        return int(pltpu.get_tpu_info().vmem_capacity_bytes)
    except Exception:
        return 64 * 1024 * 1024  # conservative (v7x-sized) fallback


# --------------------------------------------------------------------------
# Kernels
# --------------------------------------------------------------------------
def ffn_resident_kernel(x_ref, w1_ref, b1_ref, w2_ref, b2_ref, o_ref):
    # Single hidden pass: weights resident (or single H step) -> no accumulator.
    h1 = jnp.dot(x_ref[...], w1_ref[...], preferred_element_type=jnp.float32)
    h1 = h1 + b1_ref[...].astype(jnp.float32)
    g = _gelu_tanh_f32(h1)
    out = jnp.dot(g.astype(w2_ref.dtype), w2_ref[...],
                  preferred_element_type=jnp.float32)
    o_ref[...] = (out + b2_ref[...].astype(jnp.float32)).astype(o_ref.dtype)


def ffn_tiled_kernel(x_ref, w1_ref, b1_ref, w2_ref, b2_ref, o_ref, acc_ref):
    # x_ref:  (TM, D)   current row tile (constant across the H axis)
    # w1_ref: (D, TH)   hidden-tiled weight 1
    # b1_ref: (1, TH)
    # w2_ref: (TH, D)   hidden-tiled weight 2
    # b2_ref: (1, D)
    # o_ref:  (TM, D)   resident across the H axis (written on last H step)
    # acc_ref:(TM, D)   float32 VMEM accumulator scratch
    h_idx = pl.program_id(1)

    @pl.when(h_idx == 0)
    def _init():
        acc_ref[...] = jnp.zeros_like(acc_ref)

    h1 = jnp.dot(x_ref[...], w1_ref[...], preferred_element_type=jnp.float32)
    h1 = h1 + b1_ref[...].astype(jnp.float32)
    g = _gelu_tanh_f32(h1)
    acc_ref[...] += jnp.dot(g.astype(w2_ref.dtype), w2_ref[...],
                            preferred_element_type=jnp.float32)

    @pl.when(h_idx == pl.num_programs(1) - 1)
    def _finish():
        o_ref[...] = (acc_ref[...] + b2_ref[...].astype(jnp.float32)
                      ).astype(o_ref.dtype)


# --------------------------------------------------------------------------
# Wrapper
# --------------------------------------------------------------------------
def feed_forward(x, w1, b1, w2, b2, *, tile_m=None, tile_h=None,
                 weights_resident=None):
    """x: [B, T, D]; w1: [D, H]; b1: [H]; w2: [H, D]; b2: [D] -> [B, T, D]."""
    B, T, D = x.shape
    H = w1.shape[1]
    M = B * T

    x_sz = jnp.dtype(x.dtype).itemsize
    o_sz = x_sz
    w_sz = jnp.dtype(w1.dtype).itemsize

    vmem_cap = _vmem_capacity_bytes()
    # ~0.8 of physical: ~102 MiB on v5e/v6e (128 MiB), ~51 MiB on v7x (64 MiB);
    # the remainder is headroom for compiler-internal scratch.
    vmem_budget = int(0.80 * vmem_cap)
    big_vmem = vmem_cap >= 96 * 1024 * 1024

    # ---- pad H to a lane multiple (exact: gelu(0)=0, zero W2 rows add 0) ----
    H_pad = _round_up(H, 128)
    if H_pad != H:
        w1 = jnp.pad(w1, ((0, 0), (0, H_pad - H)))
        b1 = jnp.pad(b1, (0, H_pad - H))
        w2 = jnp.pad(w2, ((0, H_pad - H), (0, 0)))

    # ---- row tile: generation-aware default, MXU-friendly, >= bf16 pack ----
    if tile_m is None:
        tile_m = 1024 if big_vmem else 512
    tile_m = max(16, min(tile_m, _round_up(M, 16)))
    if tile_m >= 256:
        tile_m = (tile_m // 256) * 256      # full-height MXU tiles on v6e/v7x
    else:
        tile_m = _round_up(tile_m, 16)      # never below the bf16 sublane pack

    # ---- hidden tile: always a 128-multiple divisor of H_pad ----
    if tile_h is None:
        tile_h = 1024 if big_vmem else 512
    tile_h = _largest_aligned_divisor(H_pad, tile_h, 128)

    # ---- VMEM accounting with real itemsizes + GELU intermediates ----
    def resident_bytes(tm):
        return (2 * tm * D * x_sz                 # x tiles (double buffered)
                + 2 * tm * D * o_sz               # out tiles
                + 2 * (2 * D * H_pad) * w_sz      # W1 + W2 (allow double alloc)
                + 2 * (H_pad + D) * w_sz          # biases
                + tm * H_pad * (4 + w_sz))        # h1 (f32) + g (weight dtype)

    def tiled_bytes(tm, th):
        return (2 * tm * D * x_sz
                + 2 * tm * D * o_sz
                + 2 * (2 * D * th) * w_sz         # W1/W2 slabs (double buffered)
                + 2 * (th + D) * w_sz
                + tm * D * 4                      # f32 accumulator scratch
                + tm * th * (4 + w_sz))           # h1 (f32) + g (weight dtype)

    # ---- path selection & tile fitting ----
    if weights_resident is None:
        weights_resident = resident_bytes(tile_m) <= vmem_budget

    if weights_resident:
        while resident_bytes(tile_m) > vmem_budget and tile_m > 16:
            tile_m = max(16, tile_m // 2)
        if resident_bytes(tile_m) > vmem_budget:
            weights_resident = False              # cannot hold weights: go tiled

    if not weights_resident:
        while tiled_bytes(tile_m, tile_h) > vmem_budget:
            if tile_h > 128:
                tile_h = _largest_aligned_divisor(H_pad, tile_h // 2, 128)
            elif tile_m > 16:
                tile_m = max(16, tile_m // 2)
            else:
                break
        if tile_h == H_pad:
            # Single hidden step: skip the accumulator / init / finish passes.
            weights_resident = True

    # ---- pad ragged M and reshape ----
    m_pad = _round_up(M, tile_m)
    num_m_tiles = m_pad // tile_m
    x2d = x.reshape(M, D)
    if m_pad != M:
        x2d = jnp.pad(x2d, ((0, m_pad - M), (0, 0)))
    b1_2d = b1.reshape(1, H_pad)
    b2_2d = b2.reshape(1, D)

    # ---- advisory cost estimate ----
    weight_stream = 1 if weights_resident else num_m_tiles
    cost = pl.CostEstimate(
        flops=int(4 * m_pad * D * H_pad),
        transcendentals=int(m_pad * H_pad),
        bytes_accessed=int(m_pad * D * (x_sz + o_sz)
                           + weight_stream * (2 * D * H_pad + H_pad + D) * w_sz),
    )

    if weights_resident:
        out2d = pl.pallas_call(
            ffn_resident_kernel,
            out_shape=jax.ShapeDtypeStruct((m_pad, D), x.dtype),
            grid_spec=pltpu.PrefetchScalarGridSpec(
                num_scalar_prefetch=0,
                grid=(num_m_tiles,),
                in_specs=[
                    pl.BlockSpec((tile_m, D), lambda i: (i, 0)),   # x row tile
                    pl.BlockSpec((D, H_pad), lambda i: (0, 0)),    # W1 (resident)
                    pl.BlockSpec((1, H_pad), lambda i: (0, 0)),    # b1
                    pl.BlockSpec((H_pad, D), lambda i: (0, 0)),    # W2 (resident)
                    pl.BlockSpec((1, D), lambda i: (0, 0)),        # b2
                ],
                out_specs=pl.BlockSpec((tile_m, D), lambda i: (i, 0)),
            ),
            compiler_params=pltpu.CompilerParams(
                dimension_semantics=("parallel",),
                vmem_limit_bytes=vmem_budget,
            ),
            cost_estimate=cost,
        )(x2d, w1, b1_2d, w2, b2_2d)
    else:
        num_h_tiles = H_pad // tile_h
        out2d = pl.pallas_call(
            ffn_tiled_kernel,
            out_shape=jax.ShapeDtypeStruct((m_pad, D), x.dtype),
            grid_spec=pltpu.PrefetchScalarGridSpec(
                num_scalar_prefetch=0,
                grid=(num_m_tiles, num_h_tiles),
                in_specs=[
                    pl.BlockSpec((tile_m, D), lambda i, h: (i, 0)),   # x row tile
                    pl.BlockSpec((D, tile_h), lambda i, h: (0, h)),   # W1 slab
                    pl.BlockSpec((1, tile_h), lambda i, h: (0, h)),   # b1 slab
                    pl.BlockSpec((tile_h, D), lambda i, h: (h, 0)),   # W2 slab
                    pl.BlockSpec((1, D), lambda i, h: (0, 0)),        # b2
                ],
                out_specs=pl.BlockSpec((tile_m, D), lambda i, h: (i, 0)),
                scratch_shapes=[pltpu.VMEM((tile_m, D), jnp.float32)],
            ),
            compiler_params=pltpu.CompilerParams(
                dimension_semantics=("parallel", "arbitrary"),
                vmem_limit_bytes=vmem_budget,
            ),
            cost_estimate=cost,
        )(x2d, w1, b1_2d, w2, b2_2d)

    return out2d[:M].reshape(B, T, D)


def reference_ffn(x, w1, b1, w2, b2):
    h = _gelu_tanh_f32(jnp.dot(x, w1) + b1)
    return jnp.dot(h, w2) + b2


if __name__ == "__main__":
    cfg = {"emd_dim": 128}          # lane-aligned demo size
    D = cfg["emd_dim"]
    H = 4 * D                       # 512
    B, T = 2, 64                    # M = B*T = 128

    key = jax.random.PRNGKey(0)
    kx, k1, k2, k3, k4 = jax.random.split(key, 5)

    x = jax.random.normal(kx, (B, T, D), dtype=jnp.float32)

    # PyTorch Linear parameter shapes: W1 (H, D), W2 (D, H).
    w1_torch = jax.random.normal(k1, (H, D), dtype=jnp.float32) * (1.0 / jnp.sqrt(D))
    b1 = jax.random.normal(k2, (H,), dtype=jnp.float32) * 0.01
    w2_torch = jax.random.normal(k3, (D, H), dtype=jnp.float32) * (1.0 / jnp.sqrt(H))
    b2 = jax.random.normal(k4, (D,), dtype=jnp.float32) * 0.01

    # Glue: transpose to [in, out] so the kernel does x @ W directly.
    w1 = w1_torch.T   # (D, H)
    w2 = w2_torch.T   # (H, D)

    ref = reference_ffn(x, w1, b1, w2, b2)

    # 1) Auto path: at this size the weights-resident fast path is taken.
    out = jax.block_until_ready(feed_forward(x, w1, b1, w2, b2))
    assert out.shape == (B, T, D)
    assert jnp.allclose(out, ref, atol=2e-4, rtol=2e-4), "resident path mismatch"

    # 2) Forced H-tiled accumulation path (2 hidden steps over the accumulator).
    out_t = jax.block_until_ready(
        feed_forward(x, w1, b1, w2, b2, tile_m=128, tile_h=256,
                     weights_resident=False))
    assert jnp.allclose(out_t, ref, atol=2e-4, rtol=2e-4), "tiled path mismatch"

    # 3) bf16 activations/weights (full-rate MXU path, f32 accumulation inside).
    xb, w1b, b1b, w2b, b2b = (a.astype(jnp.bfloat16) for a in (x, w1, b1, w2, b2))
    out_b = jax.block_until_ready(feed_forward(xb, w1b, b1b, w2b, b2b))
    ref_b = reference_ffn(*(a.astype(jnp.float32) for a in (xb, w1b, b1b, w2b, b2b)))
    assert jnp.allclose(out_b.astype(jnp.float32), ref_b, atol=1e-1, rtol=1e-1), \
        "bf16 path mismatch"

    print("KERNEL_OK")
</pallas_src>

<mosaic_0001>
module attributes {stable_mosaic.version = 11 : i64} {
  func.func @ffn_resident_kernel(%arg0: i32, %arg1: memref<128x128xf32, #tpu.memory_space<vmem>>, %arg2: memref<128x512xf32, #tpu.memory_space<vmem>>, %arg3: memref<1x512xf32, #tpu.memory_space<vmem>>, %arg4: memref<512x128xf32, #tpu.memory_space<vmem>>, %arg5: memref<1x128xf32, #tpu.memory_space<vmem>>, %arg6: memref<128x128xf32, #tpu.memory_space<vmem>>) attributes {dimension_semantics = [#tpu.dimension_semantics<parallel>], iteration_bounds = array<i64: 1>, scalar_prefetch = 0 : i64, scratch_operands = 0 : i64, tpu.core_type = #tpu.core_type<tc>, window_params = [{transform_indices = @transform_0, window_bounds = array<i64: 128, 128>}, {pipeline_mode = #tpu.pipeline_mode<synchronous>, transform_indices = @transform_1, window_bounds = array<i64: 128, 512>}, {pipeline_mode = #tpu.pipeline_mode<synchronous>, transform_indices = @transform_2, window_bounds = array<i64: 1, 512>}, {pipeline_mode = #tpu.pipeline_mode<synchronous>, transform_indices = @transform_3, window_bounds = array<i64: 512, 128>}, {pipeline_mode = #tpu.pipeline_mode<synchronous>, transform_indices = @transform_4, window_bounds = array<i64: 1, 128>}, {transform_indices = @transform_5, window_bounds = array<i64: 128, 128>}]} {
    %c0 = arith.constant 0 : index
    %c0_0 = arith.constant 0 : index
    %0 = vector.load %arg1[%c0, %c0_0] : memref<128x128xf32, #tpu.memory_space<vmem>>, vector<128x128xf32>
    %c0_1 = arith.constant 0 : index
    %c0_2 = arith.constant 0 : index
    %1 = vector.load %arg2[%c0_1, %c0_2] : memref<128x512xf32, #tpu.memory_space<vmem>>, vector<128x512xf32>
    %cst = arith.constant dense<0.000000e+00> : vector<128x512xf32>
    %2 = tpu.matmul %0, %1, %cst {dimension_numbers = #tpu.dot_dimension_numbers<[1], [0], [0], [1], [0, 0, 1, 1], [], []>} : vector<128x128xf32>, vector<128x512xf32>, vector<128x512xf32> -> vector<128x512xf32>
    %c0_3 = arith.constant 0 : index
    %c0_4 = arith.constant 0 : index
    %3 = vector.load %arg3[%c0_3, %c0_4] : memref<1x512xf32, #tpu.memory_space<vmem>>, vector<1x512xf32>
    %4 = vector.broadcast %3 : vector<1x512xf32> to vector<128x512xf32>
    %5 = arith.addf %2, %4 : vector<128x512xf32>
    %cst_5 = arith.constant 5.000000e-01 : f32
    %6 = vector.broadcast %cst_5 : f32 to vector<128x512xf32>
    %7 = arith.mulf %6, %5 : vector<128x512xf32>
    %cst_6 = arith.constant 4.471500e-02 : f32
    %8 = vector.broadcast %cst_6 : f32 to vector<128x512xf32>
    %9 = arith.mulf %8, %5 : vector<128x512xf32>
    %10 = arith.mulf %9, %5 : vector<128x512xf32>
    %11 = arith.mulf %10, %5 : vector<128x512xf32>
    %12 = arith.addf %5, %11 : vector<128x512xf32>
    %cst_7 = arith.constant 0.797884583 : f32
    %13 = vector.broadcast %cst_7 : f32 to vector<128x512xf32>
    %14 = arith.mulf %13, %12 : vector<128x512xf32>
    %15 = math.tanh %14 : vector<128x512xf32>
    %cst_8 = arith.constant 1.000000e+00 : f32
    %16 = vector.broadcast %cst_8 : f32 to vector<128x512xf32>
    %17 = arith.addf %16, %15 : vector<128x512xf32>
    %18 = arith.mulf %7, %17 : vector<128x512xf32>
    %c0_9 = arith.constant 0 : index
    %c0_10 = arith.constant 0 : index
    %19 = vector.load %arg4[%c0_9, %c0_10] : memref<512x128xf32, #tpu.memory_space<vmem>>, vector<512x128xf32>
    %cst_11 = arith.constant dense<0.000000e+00> : vector<128x128xf32>
    %20 = tpu.matmul %18, %19, %cst_11 {dimension_numbers = #tpu.dot_dimension_numbers<[1], [0], [0], [1], [0, 0, 1, 1], [], []>} : vector<128x512xf32>, vector<512x128xf32>, vector<128x128xf32> -> vector<128x128xf32>
    %c0_12 = arith.constant 0 : index
    %c0_13 = arith.constant 0 : index
    %21 = vector.load %arg5[%c0_12, %c0_13] : memref<1x128xf32, #tpu.memory_space<vmem>>, vector<1x128xf32>
    %22 = vector.broadcast %21 : vector<1x128xf32> to vector<128x128xf32>
    %23 = arith.addf %20, %22 : vector<128x128xf32>
    %c0_14 = arith.constant 0 : index
    %c0_15 = arith.constant 0 : index
    %24 = vector.load %arg6[%c0_14, %c0_15] : memref<128x128xf32, #tpu.memory_space<vmem>>, vector<128x128xf32>
    tpu.vector_store %arg6[%c0_14, %c0_15], %23 {strides = array<i32>} : memref<128x128xf32, #tpu.memory_space<vmem>>, vector<128x128xf32>,
    return
  }
  func.func @transform_0(%arg0: i32) -> (i32, i32) {
    %c0_i32 = arith.constant 0 : i32
    %c0_i32_0 = arith.constant 0 : i32
    return %arg0, %c0_i32 : i32, i32
  }
  func.func @transform_1(%arg0: i32) -> (i32, i32) {
    %c0_i32 = arith.constant 0 : i32
    %c0_i32_0 = arith.constant 0 : i32
    %c0_i32_1 = arith.constant 0 : i32
    return %c0_i32, %c0_i32_0 : i32, i32
  }
  func.func @transform_2(%arg0: i32) -> (i32, i32) {
    %c0_i32 = arith.constant 0 : i32
    %c0_i32_0 = arith.constant 0 : i32
    %c0_i32_1 = arith.constant 0 : i32
    return %c0_i32, %c0_i32_0 : i32, i32
  }
  func.func @transform_3(%arg0: i32) -> (i32, i32) {
    %c0_i32 = arith.constant 0 : i32
    %c0_i32_0 = arith.constant 0 : i32
    %c0_i32_1 = arith.constant 0 : i32
    return %c0_i32, %c0_i32_0 : i32, i32
  }
  func.func @transform_4(%arg0: i32) -> (i32, i32) {
    %c0_i32 = arith.constant 0 : i32
    %c0_i32_0 = arith.constant 0 : i32
    %c0_i32_1 = arith.constant 0 : i32
    return %c0_i32, %c0_i32_0 : i32, i32
  }
  func.func @transform_5(%arg0: i32) -> (i32, i32) {
    %c0_i32 = arith.constant 0 : i32
    %c0_i32_0 = arith.constant 0 : i32
    return %arg0, %c0_i32 : i32, i32
  }
}

</mosaic_0001>

<bundles_post_ra>
// kernel: tpu_custom_call.1
= control target key start
LH: loop header
LB: loop body
LE: loop exit
PB: predicated region body
PF: predicated region fallthrough
CT: control target
= control target key end

     0   :  { %10 = vsyncpa [#allocation3], 0  ;;  %s2907_s0 = inlined_call_operand.hbm [shape: f32[128,128], index: 0, kind: input, shape index: {}]   ;;  %s2908_s1 = inlined_call_operand.hbm [shape: f32[128,512], index: 1, kind: input, shape index: {}]   ;;  %s2909_s2 = inlined_call_operand.vmem [shape: f32[1,512], index: 2, kind: input, shape index: {}]   ;;  %s2910_s3 = inlined_call_operand.hbm [shape: f32[512,128], index: 3, kind: input, shape index: {}]   ;;  %s2911_s4 = inlined_call_operand.vmem [shape: f32[1,128], index: 4, kind: input, shape index: {}]   ;;  %s2912_s5 = inlined_call_operand.hbm [shape: f32[128,128], index: 5, kind: output, shape index: {}]  }
   0x1   :  { %11 = vsyncpa [#allocation6], 0 }
   0x2   :  { %12 = vsyncpa [#allocation4], 0  ;;  %s1977_s18 = smov [#allocation5]   ;;  %s1883_s22 = scalar_lea.hbm %s2908_s1, 8192 }
   0x3   :  { %s30_s19 = sshll.u32 %s1977_s18, 4  ;;  %p1884_p0 = scmp.ne.s32.totalorder %s2908_s1, %s1883_s22  ;;  %s31_s19 = int_to_ptr.vmem [resolvable:$true] %s30_s19 }
   0x4   :  { %p1887_p1 = scmp.lt.u32.totalorder %s1883_s22, %s2908_s1 }
   0x6   :  { %p1889_p2 = pnand %p1887_p1, %p1884_p0 }
   0x8   :  { %1892 = shalt.err (!%p1889_p2)
}
   0x9   :  { %s1893_s27 = scalar_lea.vmem %s31_s19, 8192  ;;  %p1898_p4 = scmp.lt.s32.totalorder %s31_s19, %s31_s19 }
   0xa   :  { %p1894_p3 = scmp.ne.s32.totalorder %s31_s19, %s1893_s27  ;;  %p1899_p5 = scmp.lt.s32.totalorder %s1893_s27, %s1893_s27 }
   0xc   :  { %p1900_p6 = por %p1899_p5, %p1898_p4 }
   0xe   :  { %p1901_p7 = pnand %p1900_p6, %p1894_p3 }
  0x10   :  { %1904 = shalt.err (!%p1901_p7)
}
  0x11   :  { %s1978_s28 = smov 512   ;;  %s1979_s29 = smov 32  }
  0x12   :  { %36 = dma.hbm_to_vmem [thread:$0]  %s2908_s1, 8192, %s31_s19, [#allocation6], %s1978_s28, %s1978_s28, %s1979_s29  }
  0x13   :  { %s1980_s7 = smov [#allocation2]   ;;  %s1905_s11 = scalar_lea.hbm %s2907_s0, 2048 }
  0x14   :  { %s18_s8 = sshll.u32 %s1980_s7, 4  ;;  %p1906_p8 = scmp.ne.s32.totalorder %s2907_s0, %s1905_s11  ;;  %s19_s8 = int_to_ptr.vmem [resolvable:$true] %s18_s8 }
  0x15   :  { %p1909_p9 = scmp.lt.u32.totalorder %s1905_s11, %s2907_s0 }
  0x17   :  { %p1911_p10 = pnand %p1909_p9, %p1906_p8 }
  0x19   :  { %1914 = shalt.err (!%p1911_p10)
}
  0x1a   :  { %s1915_s16 = scalar_lea.vmem %s19_s8, 2048  ;;  %p1920_p12 = scmp.lt.s32.totalorder %s19_s8, %s19_s8 }
  0x1b   :  { %p1916_p11 = scmp.ne.s32.totalorder %s19_s8, %s1915_s16  ;;  %p1921_p13 = scmp.lt.s32.totalorder %s1915_s16, %s1915_s16 }
  0x1d   :  { %p1922_p0 = por %p1921_p13, %p1920_p12 }
  0x1f   :  { %p1923_p1 = pnand %p1922_p0, %p1916_p11 }
  0x21   :  { %1926 = shalt.err (!%p1923_p1)
}
  0x22   :  { %s1981_s1 = smov 128   ;;  %s1982_s17 = smov 8  }
  0x23   :  { %24 = dma.hbm_to_vmem [thread:$0]  %s2907_s0, 2048, %s19_s8, [#allocation3], %s1981_s1, %s1981_s1, %s1982_s17  }
  0x24   :  { %s1983_s20 = smov [#allocation7]   ;;  %s1927_s24 = scalar_lea.hbm %s2910_s3, 8192 }
  0x25   :  { %s44_s21 = sshll.u32 %s1983_s20, 4  ;;  %p1928_p2 = scmp.ne.s32.totalorder %s2910_s3, %s1927_s24  ;;  %s45_s21 = int_to_ptr.vmem [resolvable:$true] %s44_s21 }
  0x26   :  { %p1931_p3 = scmp.lt.u32.totalorder %s1927_s24, %s2910_s3 }
  0x28   :  { %p1933_p4 = pnand %p1931_p3, %p1928_p2 }
  0x2a   :  { %1936 = shalt.err (!%p1933_p4)
}
  0x2b   :  { %s1937_s29 = scalar_lea.vmem %s45_s21, 8192  ;;  %p1942_p6 = scmp.lt.s32.totalorder %s45_s21, %s45_s21 }
  0x2c   :  { %p1938_p5 = scmp.ne.s32.totalorder %s45_s21, %s1937_s29  ;;  %p1943_p7 = scmp.lt.s32.totalorder %s1937_s29, %s1937_s29 }
  0x2e   :  { %p1944_p8 = por %p1943_p7, %p1942_p6 }
  0x30   :  { %p1945_p9 = pnand %p1944_p8, %p1938_p5 }
  0x32   :  { %1948 = shalt.err (!%p1945_p9)
}
  0x33   :  { %50 = dma.hbm_to_vmem [thread:$0]  %s2910_s3, 8192, %s45_s21, [#allocation6], %s1981_s1, %s1981_s1, %s1982_s17  }
  0x34   :  { %1971 = dma.done.wait [#allocation3], 2048  }
  0x35   :  { %1972 = vsyncadd [#allocation3], 4294965248 }
  0x36   :  { %1973 = dma.done.wait [#allocation6], 16384  }
  0x37   :  { %1974 = vsyncadd [#allocation6], 4294950912  ;;  %v1984_v0 = vmov 0.0   ;;  %v79_v1 = vld [vmem:[#allocation5 + $0x8] sm:$0xff]  ;;  %v81_v3 = vld [vmem:[#allocation5 + $0x18] sm:$0xff] }
  0x38   :  { %228 = vmatprep.mubr.f32.mxu0 %v1984_v0  ;;  %389 = vmatprep.mubr.f32.mxu1 %v1984_v0  ;;  %v83_v2 = vld [vmem:[#allocation5 + $0x28] sm:$0xff]  ;;  %v85_v5 = vld [vmem:[#allocation5 + $0x38] sm:$0xff]  ;;  %v78_v6 = vld [vmem:[#allocation5] sm:$0xff] }
  0x39   :  { %v1618_v4 = vpack.c.bf16 %v83_v2, %v79_v1  ;;  %v82_v7 = vld [vmem:[#allocation5 + $0x20] sm:$0xff]  ;;  %v1650_v8 = vpack.c.bf16 %v85_v5, %v81_v3  ;;  %v80_v10 = vld [vmem:[#allocation5 + $0x10] sm:$0xff]  ;;  %v87_v12 = vld [vmem:[#allocation5 + $0x48] sm:$0xff] }
  0x3a   :  { %v1620_v9 = vpack.c.bf16 %v82_v7, %v78_v6  ;;  %v84_v11 = vld [vmem:[#allocation5 + $0x30] sm:$0xff]  ;;  %v91_v14 = vld [vmem:[#allocation5 + $0x68] sm:$0xff]  ;;  %v89_v15 = vld [vmem:[#allocation5 + $0x58] sm:$0xff] }
  0x3b   :  { %1619 = vmatprep.subr.bf16.mxu0 %v1618_v4  ;;  %v1652_v13 = vpack.c.bf16 %v84_v11, %v80_v10  ;;  %v93_v16 = vld [vmem:[#allocation5 + $0x78] sm:$0xff]  ;;  %1651 = vmatprep.subr.bf16.mxu1 %v1650_v8  ;;  %v1622_v17 = vpack.c.bf16 %v91_v14, %v87_v12  ;;  %v86_v19 = vld [vmem:[#allocation5 + $0x40] sm:$0xff]  ;;  %v88_v21 = vld [vmem:[#allocation5 + $0x50] sm:$0xff] }
  0x3c   :  { %1621 = vmatpush1.bf16.msra.mxu0 %v1620_v9  ;;  %v1654_v18 = vpack.c.bf16 %v93_v16, %v89_v15  ;;  %v90_v20 = vld [vmem:[#allocation5 + $0x60] sm:$0xff]  ;;  %v92_v23 = vld [vmem:[#allocation5 + $0x70] sm:$0xff]  ;;  %v95_v24 = vld [vmem:[#allocation5 + $0x88] sm:$0xff] }
  0x3d   :  { %1653 = vmatpush1.bf16.msra.mxu1 %v1652_v13  ;;  %v1624_v22 = vpack.c.bf16 %v90_v20, %v86_v19  ;;  %v99_v25 = vld [vmem:[#allocation5 + $0xa8] sm:$0xff]  ;;  %1623 = vmatprep.subr.bf16.mxu0 %v1622_v17  ;;  %v1656_v26 = vpack.c.bf16 %v92_v23, %v88_v21  ;;  %v97_v28 = vld [vmem:[#allocation5 + $0x98] sm:$0xff]  ;;  %v94_v30 = vld [vmem:[#allocation5 + $0x80] sm:$0xff] }
  0x3e   :  { %1655 = vmatprep.subr.bf16.mxu1 %v1654_v18  ;;  %v1626_v27 = vpack.c.bf16 %v99_v25, %v95_v24  ;;  %v101_v29 = vld [vmem:[#allocation5 + $0xb8] sm:$0xff]  ;;  %v98_v32 = vld [vmem:[#allocation5 + $0xa0] sm:$0xff]  ;;  %v96_v33 = vld [vmem:[#allocation5 + $0x90] sm:$0xff] }
  0x3f   :  { %v1658_v31 = vpack.c.bf16 %v101_v29, %v97_v28  ;;  %v100_v34 = vld [vmem:[#allocation5 + $0xb0] sm:$0xff]  ;;  %v1628_v35 = vpack.c.bf16 %v98_v32, %v94_v30  ;;  %v103_v36 = vld [vmem:[#allocation5 + $0xc8] sm:$0xff]  ;;  %v105_v38 = vld [vmem:[#allocation5 + $0xd8] sm:$0xff] }
  0x40   :  { %1625 = vmatpush1.bf16.msra.mxu0 %v1624_v22  ;;  %v107_v37 = vld [vmem:[#allocation5 + $0xe8] sm:$0xff]  ;;  %v1660_v39 = vpack.c.bf16 %v100_v34, %v96_v33  ;;  %v109_v41 = vld [vmem:[#allocation5 + $0xf8] sm:$0xff]  ;;  %v102_v42 = vld [vmem:[#allocation5 + $0xc0] sm:$0xff] }
  0x41   :  { %1657 = vmatpush1.bf16.msra.mxu1 %v1656_v26  ;;  %1627 = vmatprep.subr.bf16.mxu0 %v1626_v27  ;;  %v1630_v40 = vpack.c.bf16 %v107_v37, %v103_v36  ;;  %v106_v43 = vld [vmem:[#allocation5 + $0xe0] sm:$0xff]  ;;  %v1662_v44 = vpack.c.bf16 %v109_v41, %v105_v38  ;;  %v104_v45 = vld [vmem:[#allocation5 + $0xd0] sm:$0xff]  ;;  %v111_v47 = vld [vmem:[#allocation5 + $0x108] sm:$0xff] }
  0x42   :  { %1659 = vmatprep.subr.bf16.mxu1 %v1658_v31  ;;  %v108_v46 = vld [vmem:[#allocation5 + $0xf0] sm:$0xff]  ;;  %v115_v48 = vld [vmem:[#allocation5 + $0x128] sm:$0xff]  ;;  %v113_v49 = vld [vmem:[#allocation5 + $0x118] sm:$0xff]  ;;  %v1632_v51 = vpack.c.bf16 %v106_v43, %v102_v42 }
  0x43   :  { %v117_v50 = vld [vmem:[#allocation5 + $0x138] sm:$0xff]  ;;  %v1664_v52 = vpack.c.bf16 %v108_v46, %v104_v45  ;;  %v1634_v53 = vpack.c.bf16 %v115_v48, %v111_v47  ;;  %v110_v54 = vld [vmem:[#allocation5 + $0x100] sm:$0xff]  ;;  %v112_v56 = vld [vmem:[#allocation5 + $0x110] sm:$0xff] }
  0x44   :  { %1629 = vmatpush1.bf16.msra.mxu0 %v1628_v35  ;;  %v114_v55 = vld [vmem:[#allocation5 + $0x120] sm:$0xff]  ;;  %v1666_v57 = vpack.c.bf16 %v117_v50, %v113_v49  ;;  %v116_v58 = vld [vmem:[#allocation5 + $0x130] sm:$0xff]  ;;  %v119_v59 = vld [vmem:[#allocation5 + $0x148] sm:$0xff] }
  0x45   :  { %1661 = vmatpush1.bf16.msra.mxu1 %v1660_v39  ;;  %1631 = vmatprep.subr.bf16.mxu0 %v1630_v40  ;;  %v123_v60 = vld [vmem:[#allocation5 + $0x168] sm:$0xff]  ;;  %v121_v61 = vld [vmem:[#allocation5 + $0x158] sm:$0xff]  ;;  %v1636_v63 = vpack.c.bf16 %v114_v55, %v110_v54  ;;  %v1668_v1 = vpack.c.bf16 %v116_v58, %v112_v56  ;;  %v118_v3 = vld [vmem:[#allocation5 + $0x140] sm:$0xff] }
  0x46   :  { %1663 = vmatprep.subr.bf16.mxu1 %v1662_v44  ;;  %v125_v62 = vld [vmem:[#allocation5 + $0x178] sm:$0xff]  ;;  %v1638_v2 = vpack.c.bf16 %v123_v60, %v119_v59  ;;  %v122_v4 = vld [vmem:[#allocation5 + $0x160] sm:$0xff]  ;;  %v120_v5 = vld [vmem:[#allocation5 + $0x150] sm:$0xff] }
  0x47   :  { %v1670_v6 = vpack.c.bf16 %v125_v62, %v121_v61  ;;  %v124_v7 = vld [vmem:[#allocation5 + $0x170] sm:$0xff]  ;;  %v127_v8 = vld [vmem:[#allocation5 + $0x188] sm:$0xff]  ;;  %v129_v10 = vld [vmem:[#allocation5 + $0x198] sm:$0xff]  ;;  %v1640_v12 = vpack.c.bf16 %v122_v4, %v118_v3 }
  0x48   :  { %1633 = vmatpush1.bf16.msra.mxu0 %v1632_v51  ;;  %v131_v9 = vld [vmem:[#allocation5 + $0x1a8] sm:$0xff]  ;;  %v133_v11 = vld [vmem:[#allocation5 + $0x1b8] sm:$0xff]  ;;  %v1672_v13 = vpack.c.bf16 %v124_v7, %v120_v5  ;;  %v126_v15 = vld [vmem:[#allocation5 + $0x180] sm:$0xff] }
  0x49   :  { %1665 = vmatpush1.bf16.msra.mxu1 %v1664_v52  ;;  %1635 = vmatprep.subr.bf16.mxu0 %v1634_v53  ;;  %v1642_v14 = vpack.c.bf16 %v131_v9, %v127_v8  ;;  %v130_v16 = vld [vmem:[#allocation5 + $0x1a0] sm:$0xff]  ;;  %v128_v17 = vld [vmem:[#allocation5 + $0x190] sm:$0xff]  ;;  %v1674_v18 = vpack.c.bf16 %v133_v11, %v129_v10  ;;  %v135_v20 = vld [vmem:[#allocation5 + $0x1c8] sm:$0xff] }
  0x4a   :  { %1667 = vmatprep.subr.bf16.mxu1 %v1666_v57  ;;  %v132_v19 = vld [vmem:[#allocation5 + $0x1b0] sm:$0xff]  ;;  %v139_v21 = vld [vmem:[#allocation5 + $0x1e8] sm:$0xff]  ;;  %v137_v22 = vld [vmem:[#allocation5 + $0x1d8] sm:$0xff]  ;;  %v1644_v24 = vpack.c.bf16 %v130_v16, %v126_v15 }
  0x4b   :  { %v141_v23 = vld [vmem:[#allocation5 + $0x1f8] sm:$0xff]  ;;  %v1676_v25 = vpack.c.bf16 %v132_v19, %v128_v17  ;;  %v1646_v26 = vpack.c.bf16 %v139_v21, %v135_v20  ;;  %v134_v27 = vld [vmem:[#allocation5 + $0x1c0] sm:$0xff]  ;;  %v136_v30 = vld [vmem:[#allocation5 + $0x1d0] sm:$0xff] }
  0x4c   :  { %1637 = vmatpush1.bf16.msra.mxu0 %v1636_v63  ;;  %v138_v28 = vld [vmem:[#allocation5 + $0x1e0] sm:$0xff]  ;;  %v1678_v29 = vpack.c.bf16 %v141_v23, %v137_v22  ;;  %v140_v31 = vld [vmem:[#allocation5 + $0x1f0] sm:$0xff]  ;;  %v1079_v33 = vld [vmem:[#allocation7 + $0x88] sm:$0xff] }
  0x4d   :  { %1669 = vmatpush1.bf16.msra.mxu1 %v1668_v1  ;;  %1639 = vmatprep.subr.bf16.mxu0 %v1638_v2  ;;  %v1078_v32 = vld [vmem:[#allocation7 + $0x80] sm:$0xff]  ;;  %v1648_v34 = vpack.c.bf16 %v138_v28, %v134_v27  ;;  %v1111_v36 = vld [vmem:[#allocation7 + $0x188] sm:$0xff]  ;;  %v1680_v37 = vpack.c.bf16 %v140_v31, %v136_v30  ;;  %v1080_v44 = vld [vmem:[#allocation7 + $0x90] sm:$0xff] }
  0x4e   :  { %1671 = vmatprep.subr.bf16.mxu1 %v1670_v6  ;;  %v1110_v35 = vld [vmem:[#allocation7 + $0x180] sm:$0xff]  ;;  %v1682_v38 = vpack.c.bf16 %v1079_v33, %v1078_v32  ;;  %v1063_v40 = vld [vmem:[#allocation7 + $0x8] sm:$0xff]  ;;  %v1081_v45 = vld [vmem:[#allocation7 + $0x98] sm:$0xff] }
  0x4f   :  { %v1062_v39 = vld [vmem:[#allocation7] sm:$0xff]  ;;  %v1714_v41 = vpack.c.bf16 %v1111_v36, %v1110_v35  ;;  %v1095_v43 = vld [vmem:[#allocation7 + $0x108] sm:$0xff]  ;;  %v1112_v47 = vld [vmem:[#allocation7 + $0x190] sm:$0xff]  ;;  %v1686_v51 = vpack.c.bf16 %v1081_v45, %v1080_v44 }
  0x50   :  { %1641 = vmatpush1.bf16.msra.mxu0 %v1640_v12  ;;  %v1094_v42 = vld [vmem:[#allocation7 + $0x100] sm:$0xff]  ;;  %v1113_v48 = vld [vmem:[#allocation7 + $0x198] sm:$0xff]  ;;  %v1684_v49 = vpack.c.bf16 %v1063_v40, %v1062_v39  ;;  %v1064_v52 = vld [vmem:[#allocation7 + $0x10] sm:$0xff] }
  0x51   :  { %1673 = vmatpush1.bf16.msra.mxu1 %v1672_v13  ;;  %1643 = vmatprep.subr.bf16.mxu0 %v1642_v14  ;;  %v62_v46 = vld [vmem:[#allocation2] sm:$0xff]  ;;  %v1716_v50 = vpack.c.bf16 %v1095_v43, %v1094_v42  ;;  %v1065_v53 = vld [vmem:[#allocation7 + $0x18] sm:$0xff]  ;;  %v1096_v54 = vld [vmem:[#allocation7 + $0x110] sm:$0xff]  ;;  %v1718_v55 = vpack.c.bf16 %v1113_v48, %v1112_v47 }
  0x52   :  { %1675 = vmatprep.subr.bf16.mxu1 %v1674_v18  ;;  %v1097_v56 = vld [vmem:[#allocation7 + $0x118] sm:$0xff]  ;;  %v1082_v57 = vld [vmem:[#allocation7 + $0xa0] sm:$0xff]  ;;  %v1083_v58 = vld [vmem:[#allocation7 + $0xa8] sm:$0xff]  ;;  %v1688_v62 = vpack.c.bf16 %v1065_v53, %v1064_v52 }
  0x53   :  { %v63_v59 = vld [vmem:[#allocation2 + $0x8] sm:$0xff]  ;;  %v1114_v60 = vld [vmem:[#allocation7 + $0x1a0] sm:$0xff]  ;;  %v1720_v63 = vpack.c.bf16 %v1097_v56, %v1096_v54  ;;  %v1690_v1 = vpack.c.bf16 %v1083_v58, %v1082_v57  ;;  %v1084_v7 = vld [vmem:[#allocation7 + $0xb0] sm:$0xff] }
  0x54   :  { %1645 = vmatpush1.bf16.msra.mxu0 %v1644_v24  ;;  %v1115_v61 = vld [vmem:[#allocation7 + $0x1a8] sm:$0xff]  ;;  %v1066_v2 = vld [vmem:[#allocation7 + $0x20] sm:$0xff]  ;;  %v1085_v8 = vld [vmem:[#allocation7 + $0xb8] sm:$0xff] }
  0x55   :  { %1677 = vmatpush1.bf16.msra.mxu1 %v1676_v25  ;;  %1647 = vmatprep.subr.bf16.mxu0 %v1646_v26  ;;  %v1067_v3 = vld [vmem:[#allocation7 + $0x28] sm:$0xff]  ;;  %v1098_v4 = vld [vmem:[#allocation7 + $0x120] sm:$0xff]  ;;  %v1722_v5 = vpack.c.bf16 %v1115_v61, %v1114_v60  ;;  %v64_v9 = vld [vmem:[#allocation2 + $0x10] sm:$0xff]  ;;  %v1694_v14 = vpack.c.bf16 %v1085_v8, %v1084_v7 }
  0x56   :  { %1679 = vmatprep.subr.bf16.mxu1 %v1678_v29  ;;  %v1099_v6 = vld [vmem:[#allocation7 + $0x128] sm:$0xff]  ;;  %v1116_v10 = vld [vmem:[#allocation7 + $0x1b0] sm:$0xff]  ;;  %v1117_v11 = vld [vmem:[#allocation7 + $0x1b8] sm:$0xff]  ;;  %v1692_v12 = vpack.c.bf16 %v1067_v3, %v1066_v2 }
  0x57   :  { %v1724_v13 = vpack.c.bf16 %v1099_v6, %v1098_v4  ;;  %v1068_v15 = vld [vmem:[#allocation7 + $0x30] sm:$0xff]  ;;  %v1069_v16 = vld [vmem:[#allocation7 + $0x38] sm:$0xff]  ;;  %v1726_v18 = vpack.c.bf16 %v1117_v11, %v1116_v10  ;;  %v1086_v20 = vld [vmem:[#allocation7 + $0xc0] sm:$0xff] }
  0x58   :  { %1649 = vmatpush1.bf16.msra.mxu0 %v1648_v34  ;;  %v1100_v17 = vld [vmem:[#allocation7 + $0x130] sm:$0xff]  ;;  %v1101_v19 = vld [vmem:[#allocation7 + $0x138] sm:$0xff]  ;;  %v1087_v21 = vld [vmem:[#allocation7 + $0xc8] sm:$0xff]  ;;  %v1696_v25 = vpack.c.bf16 %v1069_v16, %v1068_v15 }
  0x59   :  { %1681 = vmatpush1.bf16.msra.mxu1 %v1680_v37  ;;  %1683 = vmatprep.subr.bf16.mxu0 %v1682_v38  ;;  %v65_v22 = vld [vmem:[#allocation2 + $0x18] sm:$0xff]  ;;  %v1118_v23 = vld [vmem:[#allocation7 + $0x1c0] sm:$0xff]  ;;  %v1119_v24 = vld [vmem:[#allocation7 + $0x1c8] sm:$0xff]  ;;  %v1728_v26 = vpack.c.bf16 %v1101_v19, %v1100_v17  ;;  %v1698_v27 = vpack.c.bf16 %v1087_v21, %v1086_v20  ;;  %v144_v19 = vlaneseq }
  0x5a   :  { %1715 = vmatprep.subr.bf16.mxu1 %v1714_v41  ;;  %v1070_v28 = vld [vmem:[#allocation7 + $0x40] sm:$0xff]  ;;  %v1071_v29 = vld [vmem:[#allocation7 + $0x48] sm:$0xff]  ;;  %v1730_v30 = vpack.c.bf16 %v1119_v24, %v1118_v23  ;;  %v68_v34 = vld [vmem:[#allocation2 + $0x30] sm:$0xff] }
  0x5b   :  { %229 = vmatmul.mubr.f32.vlgmr.msra.gmra.mrb[0].mxu0 %v62_v46  ;;  %v66_v31 = vld [vmem:[#allocation2 + $0x20] sm:$0xff]  ;;  %v1700_v32 = vpack.c.bf16 %v1071_v29, %v1070_v28  ;;  %v67_v33 = vld [vmem:[#allocation2 + $0x28] sm:$0xff]  ;;  %v69_v35 = vld [vmem:[#allocation2 + $0x38] sm:$0xff]  ;;  %v145_v20 = vshrl.u32 %v144_v19, 7 }
  0x5c   :  { %390 = vmatmul.mubr.f32.vlgmr.msra.gmra.mrb[0].mxu1 %v62_v46  ;;  %234 = vmatprep.mubr.f32.mxu0 %v1984_v0  ;;  %v70_v36 = vld [vmem:[#allocation2 + $0x40] sm:$0xff]  ;;  %v71_v37 = vld [vmem:[#allocation2 + $0x48] sm:$0xff]  ;;  %v72_v38 = vld [vmem:[#allocation2 + $0x50] sm:$0xff] }
  0x5d   :  { %395 = vmatprep.mubr.f32.mxu1 %v1984_v0  ;;  %1685 = vmatpush3.bf16.msra.mxu0 %v1684_v49  ;;  %v73_v39 = vld [vmem:[#allocation2 + $0x58] sm:$0xff]  ;;  %v74_v40 = vld [vmem:[#allocation2 + $0x60] sm:$0xff]  ;;  %v75_v41 = vld [vmem:[#allocation2 + $0x68] sm:$0xff]  ;;  %v146_v21 = vsub.s32 0, %v145_v20  ;;  %v154_v23 = vsub.s32 2, %v145_v20  ;;  %v150_v24 = vsub.s32 1, %v145_v20 }
  0x5e   :  { %1717 = vmatpush3.bf16.msra.mxu1 %v1716_v50  ;;  %1687 = vmatprep.subr.bf16.mxu0 %v1686_v51  ;;  %v76_v42 = vld [vmem:[#allocation2 + $0x70] sm:$0xff]  ;;  %v77_v43 = vld [vmem:[#allocation2 + $0x78] sm:$0xff]  ;;  %v1102_v44 = vld [vmem:[#allocation7 + $0x140] sm:$0xff] }
  0x5f   :  { %235 = vmatmul.mubr.f32.gmra.mrb[2].mxu0 %v63_v59  ;;  %1719 = vmatprep.subr.bf16.mxu1 %v1718_v55  ;;  %v1103_v45 = vld [vmem:[#allocation7 + $0x148] sm:$0xff]  ;;  %v1088_v47 = vld [vmem:[#allocation7 + $0xd0] sm:$0xff]  ;;  %v1089_v48 = vld [vmem:[#allocation7 + $0xd8] sm:$0xff] }
  0x60   :  { %396 = vmatmul.mubr.f32.gmra.mrb[2].mxu1 %v63_v59  ;;  %240 = vmatprep.mubr.f32.mxu0 %v1984_v0  ;;  %v1732_v46 = vpack.c.bf16 %v1103_v45, %v1102_v44  ;;  %v1072_v49 = vld [vmem:[#allocation7 + $0x50] sm:$0xff]  ;;  %v1702_v50 = vpack.c.bf16 %v1089_v48, %v1088_v47  ;;  %v1073_v51 = vld [vmem:[#allocation7 + $0x58] sm:$0xff]  ;;  %v1091_v59 = vld [vmem:[#allocation7 + $0xe8] sm:$0xff] }
  0x61   :  { %401 = vmatprep.mubr.f32.mxu1 %v1984_v0  ;;  %1689 = vmatpush3.bf16.msra.mxu0 %v1688_v62  ;;  %v1120_v52 = vld [vmem:[#allocation7 + $0x1d0] sm:$0xff]  ;;  %v1121_v53 = vld [vmem:[#allocation7 + $0x1d8] sm:$0xff]  ;;  %v1704_v54 = vpack.c.bf16 %v1073_v51, %v1072_v49  ;;  %v1074_v60 = vld [vmem:[#allocation7 + $0x60] sm:$0xff] }
  0x62   :  { %1721 = vmatpush3.bf16.msra.mxu1 %v1720_v63  ;;  %1691 = vmatprep.subr.bf16.mxu0 %v1690_v1  ;;  %v1734_v55 = vpack.c.bf16 %v1121_v53, %v1120_v52  ;;  %v1104_v56 = vld [vmem:[#allocation7 + $0x150] sm:$0xff]  ;;  %v1105_v57 = vld [vmem:[#allocation7 + $0x158] sm:$0xff]  ;;  %v1075_v62 = vld [vmem:[#allocation7 + $0x68] sm:$0xff] }
  0x63   :  { %241 = vmatmul.mubr.f32.gmra.mrb[4].mxu0 %v64_v9  ;;  %1723 = vmatprep.subr.bf16.mxu1 %v1722_v5  ;;  %v1736_v58 = vpack.c.bf16 %v1105_v57, %v1104_v56  ;;  %v1122_v63 = vld [vmem:[#allocation7 + $0x1e0] sm:$0xff]  ;;  %v1123_v1 = vld [vmem:[#allocation7 + $0x1e8] sm:$0xff]  ;;  %v1708_v2 = vpack.c.bf16 %v1075_v62, %v1074_v60  ;;  %v1092_v7 = vld [vmem:[#allocation7 + $0xf0] sm:$0xff] }
  0x64   :  { %402 = vmatmul.mubr.f32.gmra.mrb[4].mxu1 %v64_v9  ;;  %246 = vmatprep.mubr.f32.mxu0 %v1984_v0  ;;  %v1738_v3 = vpack.c.bf16 %v1123_v1, %v1122_v63  ;;  %v1106_v4 = vld [vmem:[#allocation7 + $0x160] sm:$0xff]  ;;  %v1107_v5 = vld [vmem:[#allocation7 + $0x168] sm:$0xff]  ;;  %v1093_v8 = vld [vmem:[#allocation7 + $0xf8] sm:$0xff] }
  0x65   :  { %407 = vmatprep.mubr.f32.mxu1 %v1984_v0  ;;  %1693 = vmatpush3.bf16.msra.mxu0 %v1692_v12  ;;  %v1740_v6 = vpack.c.bf16 %v1107_v5, %v1106_v4  ;;  %v1124_v9 = vld [vmem:[#allocation7 + $0x1f0] sm:$0xff]  ;;  %v1710_v10 = vpack.c.bf16 %v1093_v8, %v1092_v7  ;;  %v1077_v12 = vld [vmem:[#allocation7 + $0x78] sm:$0xff] }
  0x66   :  { %1725 = vmatpush3.bf16.msra.mxu1 %v1724_v13  ;;  %1695 = vmatprep.subr.bf16.mxu0 %v1694_v14  ;;  %v1076_v11 = vld [vmem:[#allocation7 + $0x70] sm:$0xff]  ;;  %v1125_v13 = vld [vmem:[#allocation7 + $0x1f8] sm:$0xff] }
  0x67   :  { %247 = vmatmul.mubr.f32.gmra.mrb[6].mxu0 %v65_v22  ;;  %1727 = vmatprep.subr.bf16.mxu1 %v1726_v18  ;;  %v1712_v14 = vpack.c.bf16 %v1077_v12, %v1076_v11  ;;  %v1742_v15 = vpack.c.bf16 %v1125_v13, %v1124_v9  ;;  %v1108_v16 = vld [vmem:[#allocation7 + $0x170] sm:$0xff]  ;;  %v1109_v17 = vld [vmem:[#allocation7 + $0x178] sm:$0xff] }
  0x68   :  { %408 = vmatmul.mubr.f32.gmra.mrb[6].mxu1 %v65_v22  ;;  %252 = vmatprep.mubr.f32.mxu0 %v1984_v0  ;;  %v1744_v18 = vpack.c.bf16 %v1109_v17, %v1108_v16  ;;  %v142_v22 = vld [vmem:[%s2909_s2] sm:$0xf] }
  0x69   :  { %413 = vmatprep.mubr.f32.mxu1 %v1984_v0  ;;  %1697 = vmatpush3.bf16.msra.mxu0 %v1696_v25  ;;  %v2093_v25 = vrot.slane %v142_v22, %v146_v21  ;;  %v2097_v28 = vrot.slane %v142_v22, %v150_v24 }
  0x6a   :  { %1729 = vmatpush3.bf16.msra.mxu1 %v1728_v26  ;;  %1699 = vmatprep.subr.bf16.mxu0 %v1698_v27  ;;  %v158_v26 = vsub.s32 3, %v145_v20  ;;  %v2095_v27 = vrot.slane %v142_v22, %v154_v23 }
  0x6b   :  { %253 = vmatmul.mubr.f32.gmra.mrb[8].mxu0 %v66_v31  ;;  %1731 = vmatprep.subr.bf16.mxu1 %v1730_v30 }
  0x6c   :  { %414 = vmatmul.mubr.f32.gmra.mrb[8].mxu1 %v66_v31  ;;  %258 = vmatprep.mubr.f32.mxu0 %v1984_v0 }
  0x6d   :  { %419 = vmatprep.mubr.f32.mxu1 %v1984_v0  ;;  %1701 = vmatpush3.bf16.msra.mxu0 %v1700_v32 }
  0x6e   :  { %1733 = vmatpush3.bf16.msra.mxu1 %v1732_v46  ;;  %1703 = vmatprep.subr.bf16.mxu0 %v1702_v50 }
  0x6f   :  { %259 = vmatmul.mubr.f32.gmra.mrb[10].mxu0 %v67_v33  ;;  %1735 = vmatprep.subr.bf16.mxu1 %v1734_v55 }
  0x70   :  { %420 = vmatmul.mubr.f32.gmra.mrb[10].mxu1 %v67_v33  ;;  %264 = vmatprep.mubr.f32.mxu0 %v1984_v0  ;;  %v2100_v33 = vrot.slane %v142_v22, %v158_v26 }
  0x71   :  { %425 = vmatprep.mubr.f32.mxu1 %v1984_v0  ;;  %1705 = vmatpush3.bf16.msra.mxu0 %v1704_v54 }
  0x72   :  { %1737 = vmatpush3.bf16.msra.mxu1 %v1736_v58 }
  0x73   :  { %265 = vmatmul.mubr.f32.gmra.mrb[12].mxu0 %v68_v34  ;;  %1739 = vmatprep.subr.bf16.mxu1 %v1738_v3 }
  0x74   :  { %426 = vmatmul.mubr.f32.gmra.mrb[12].mxu1 %v68_v34  ;;  %270 = vmatprep.mubr.f32.mxu0 %v1984_v0 }
  0x75   :  { %431 = vmatprep.mubr.f32.mxu1 %v1984_v0 }
  0x76   :  { %1741 = vmatpush3.bf16.msra.mxu1 %v1740_v6 }
  0x77   :  { %271 = vmatmul.mubr.f32.gmra.mrb[14].mxu0 %v69_v35  ;;  %1743 = vmatprep.subr.bf16.mxu1 %v1742_v15 }
  0x78   :  { %432 = vmatmul.mubr.f32.gmra.mrb[14].mxu1 %v69_v35  ;;  %276 = vmatprep.mubr.f32.mxu0 %v1984_v0 }
  0x79   :  { %437 = vmatprep.mubr.f32.mxu1 %v1984_v0 }
  0x7a   :  { %1745 = vmatpush3.bf16.msra.mxu1 %v1744_v18 }
  0x7b   :  { %277 = vmatmul.mubr.f32.gmra.mrb[16].mxu0 %v70_v36 }
  0x7c   :  { %438 = vmatmul.mubr.f32.gmra.mrb[16].mxu1 %v70_v36  ;;  %282 = vmatprep.mubr.f32.mxu0 %v1984_v0 }
  0x7d   :  { %443 = vmatprep.mubr.f32.mxu1 %v1984_v0 }
  0x7f   :  { %283 = vmatmul.mubr.f32.gmra.mrb[18].mxu0 %v71_v37 }
  0x80   :  { %444 = vmatmul.mubr.f32.gmra.mrb[18].mxu1 %v71_v37  ;;  %288 = vmatprep.mubr.f32.mxu0 %v1984_v0 }
  0x81   :  { %449 = vmatprep.mubr.f32.mxu1 %v1984_v0 }
  0x83   :  { %289 = vmatmul.mubr.f32.gmra.mrb[20].mxu0 %v72_v38 }
  0x84   :  { %450 = vmatmul.mubr.f32.gmra.mrb[20].mxu1 %v72_v38  ;;  %294 = vmatprep.mubr.f32.mxu0 %v1984_v0 }
  0x85   :  { %455 = vmatprep.mubr.f32.mxu1 %v1984_v0 }
  0x87   :  { %295 = vmatmul.mubr.f32.gmra.mrb[22].mxu0 %v73_v39 }
  0x88   :  { %456 = vmatmul.mubr.f32.gmra.mrb[22].mxu1 %v73_v39  ;;  %300 = vmatprep.mubr.f32.mxu0 %v1984_v0 }
  0x89   :  { %461 = vmatprep.mubr.f32.mxu1 %v1984_v0 }
  0x8b   :  { %301 = vmatmul.mubr.f32.gmra.mrb[24].mxu0 %v74_v40 }
  0x8c   :  { %462 = vmatmul.mubr.f32.gmra.mrb[24].mxu1 %v74_v40  ;;  %306 = vmatprep.mubr.f32.mxu0 %v1984_v0 }
  0x8d   :  { %467 = vmatprep.mubr.f32.mxu1 %v1984_v0 }
  0x8f   :  { %307 = vmatmul.mubr.f32.gmra.mrb[26].mxu0 %v75_v41 }
  0x90   :  { %468 = vmatmul.mubr.f32.gmra.mrb[26].mxu1 %v75_v41  ;;  %312 = vmatprep.mubr.f32.mxu0 %v1984_v0 }
  0x91   :  { %473 = vmatprep.mubr.f32.mxu1 %v1984_v0 }
  0x93   :  { %313 = vmatmul.mubr.f32.gmra.mrb[28].mxu0 %v76_v42 }
  0x94   :  { %474 = vmatmul.mubr.f32.gmra.mrb[28].mxu1 %v76_v42  ;;  %318 = vmatprep.mubr.f32.mxu0 %v1984_v0 }
  0x95   :  { %479 = vmatprep.mubr.f32.mxu1 %v1984_v0  ;;  %v1090_v0 = vld [vmem:[#allocation7 + $0xe0] sm:$0xff] }
  0x96   :  { %v1706_v61 = vpack.c.bf16 %v1091_v59, %v1090_v0 }
  0x97   :  { %319 = vmatmul.mubr.f32.gmra.mrb[30].mxu0 %v77_v43 }
  0x98   :  { %480 = vmatmul.mubr.f32.gmra.mrb[30].mxu1 %v77_v43  ;;  %1707 = vmatprep.subr.bf16.mxu0 %v1706_v61 }
  0x99   :  { %1709 = vmatpush3.bf16.msra.mxu0 %v1708_v2 }
  0x9a   :  { %1711 = vmatprep.subr.bf16.mxu0 %v1710_v10 }
  0x9d   :  { %1713 = vmatpush3.bf16.msra.mxu0 %v1712_v14 }
 0x12e   :  { %v230_v29 = vpop.f32.mrb[0].mxu0 }
 0x12f   :  { %v231_v30 = vadd.f32 %v230_v29, %v2093_v25  ;;  %v391_v31 = vpop.f32.mrb[0].mxu1  ;;  %v232_v32 = vpop.f32.mrb[1].mxu0 }
 0x130   :  { %v392_v34 = vadd.f32 %v391_v31, %v2095_v27  ;;  %v233_v35 = vadd.f32 %v232_v32, %v2097_v28  ;;  %v393_v36 = vpop.f32.mrb[1].mxu1 }
 0x131   :  { %v550_v37 = vmul.f32 0.044715, %v231_v30  ;;  %v2105_v42 = vadd.f32 %v393_v36, %v2100_v33  ;;  %v2124_v61 = vmul.f32 0.5, %v231_v30 }
 0x132   :  { %v552_v38 = vmul.f32 0.044715, %v392_v34  ;;  %v551_v39 = vmul.f32 0.044715, %v233_v35  ;;  %v236_v40 = vpop.f32.mrb[2].mxu0  ;;  %v2130_v4 = vmul.f32 0.5, %v392_v34 }
 0x133   :  { %v614_v41 = vmul.f32 %v550_v37, %v231_v30  ;;  %v2108_v43 = vadd.f32 %v236_v40, %v2093_v25  ;;  %v397_v44 = vpop.f32.mrb[2].mxu1  ;;  %v238_v45 = vpop.f32.mrb[3].mxu0  ;;  %v553_v57 = vmul.f32 0.044715, %v2105_v42  ;;  %v2135_v6 = vmul.f32 0.5, %v233_v35 }
 0x134   :  { %v616_v46 = vmul.f32 %v552_v38, %v392_v34  ;;  %v615_v47 = vmul.f32 %v551_v39, %v233_v35  ;;  %v2111_v48 = vadd.f32 %v397_v44, %v2095_v27  ;;  %v399_v49 = vpop.f32.mrb[3].mxu1  ;;  %v2114_v52 = vadd.f32 %v238_v45, %v2097_v28 }
 0x135   :  { %v678_v50 = vmul.f32 %v614_v41, %v231_v30  ;;  %v2117_v53 = vadd.f32 %v399_v49, %v2100_v33  ;;  %v554_v58 = vmul.f32 0.044715, %v2108_v43  ;;  %v617_v12 = vmul.f32 %v553_v57, %v2105_v42 }
 0x136   :  { %v680_v51 = vmul.f32 %v616_v46, %v392_v34  ;;  %v242_v54 = vpop.f32.mrb[4].mxu0  ;;  %v679_v55 = vmul.f32 %v615_v47, %v233_v35  ;;  %v556_v63 = vmul.f32 0.044715, %v2111_v48  ;;  %v555_v7 = vmul.f32 0.044715, %v2114_v52 }
 0x137   :  { %v742_v56 = vadd.f32 %v678_v50, %v231_v30  ;;  %v2122_v0 = vadd.f32 %v242_v54, %v2093_v25  ;;  %v403_v59 = vpop.f32.mrb[4].mxu1  ;;  %v244_v60 = vpop.f32.mrb[5].mxu0  ;;  %v557_v8 = vmul.f32 0.044715, %v2117_v53  ;;  %v2144_v13 = vmul.f32 %v554_v58, %v2108_v43 }
 0x138   :  { %v744_v62 = vadd.f32 %v680_v51, %v392_v34  ;;  %v2128_v1 = vadd.f32 %v403_v59, %v2095_v27  ;;  %v405_v2 = vpop.f32.mrb[5].mxu1  ;;  %v2133_v5 = vadd.f32 %v244_v60, %v2097_v28  ;;  %v743_v11 = vadd.f32 %v679_v55, %v233_v35 }
 0x139   :  { %v806_v3 = vmul.f32 0.7978846, %v742_v56  ;;  %v2140_v9 = vadd.f32 %v405_v2, %v2100_v33  ;;  %v558_v14 = vmul.f32 0.044715, %v2122_v0  ;;  %v2151_v19 = vmul.f32 %v556_v63, %v2111_v48 }
 0x13a   :  { %v248_v10 = vpop.f32.mrb[6].mxu0  ;;  %v808_v18 = vmul.f32 0.7978846, %v744_v62  ;;  %v560_v20 = vmul.f32 0.044715, %v2128_v1  ;;  %v619_v29 = vmul.f32 %v555_v7, %v2114_v52  ;;  %v2166_v30 = vmul.f32 %v557_v8, %v2117_v53 }
 0x13b   :  { %v2148_v15 = vadd.f32 %v248_v10, %v2093_v25  ;;  %v409_v16 = vpop.f32.mrb[6].mxu1  ;;  %v250_v17 = vpop.f32.mrb[7].mxu0  ;;  %1755 = vtanh.f32 %v806_v3  ;;  %v559_v23 = vmul.f32 0.044715, %v2133_v5  ;;  %v561_v31 = vmul.f32 0.044715, %v2140_v9 }
 0x13c   :  { %v2155_v21 = vadd.f32 %v409_v16, %v2095_v27  ;;  %v411_v22 = vpop.f32.mrb[7].mxu1  ;;  %v2159_v24 = vadd.f32 %v250_v17, %v2097_v28  ;;  %v807_v34 = vmul.f32 0.7978846, %v743_v11  ;;  %v2170_v35 = vmul.f32 %v558_v14, %v2122_v0 }
 0x13d   :  { %v2162_v26 = vadd.f32 %v411_v22, %v2100_v33  ;;  %v562_v36 = vmul.f32 0.044715, %v2148_v15  ;;  %v2185_v47 = vmul.f32 %v560_v20, %v2128_v1  ;;  %v2192_v51 = vmul.f32 %v559_v23, %v2133_v5 }
 0x13e   :  { %v254_v32 = vpop.f32.mrb[8].mxu0  ;;  %v564_v37 = vmul.f32 0.044715, %v2155_v21  ;;  %v563_v41 = vmul.f32 0.044715, %v2159_v24  ;;  %1757 = vtanh.f32 %v807_v34  ;;  %v2195_v54 = vmul.f32 %v561_v31, %v2140_v9 }
 0x13f   :  { %v2175_v38 = vadd.f32 %v254_v32, %v2093_v25  ;;  %v415_v39 = vpop.f32.mrb[8].mxu1  ;;  %v256_v40 = vpop.f32.mrb[9].mxu0  ;;  %1759 = vtanh.f32 %v808_v18  ;;  %v565_v49 = vmul.f32 0.044715, %v2162_v26  ;;  %v2198_v56 = vmul.f32 0.5, %v2105_v42 }
 0x140   :  { %v2179_v44 = vadd.f32 %v415_v39, %v2095_v27  ;;  %v2182_v45 = vadd.f32 %v256_v40, %v2097_v28  ;;  %v417_v46 = vpop.f32.mrb[9].mxu1  ;;  %v681_v57 = vmul.f32 %v617_v12, %v2105_v42  ;;  %v2202_v58 = vmul.f32 %v562_v36, %v2148_v15 }
 0x141   :  { %2961 = vst [vmem:[#allocation12_spill] sm:$0xff] %v2175_v38  ;;  %v2189_v50 = vadd.f32 %v417_v46, %v2100_v33  ;;  %v2205_v59 = vmul.f32 %v564_v37, %v2155_v21  ;;  %v566_v60 = vmul.f32 0.044715, %v2175_v38  ;;  %v2212_v3 = vmul.f32 %v563_v41, %v2159_v24 }
 0x142   :  { %2962 = vst [vmem:[#allocation13_spill] sm:$0xff] %v2179_v44  ;;  %v260_v55 = vpop.f32.mrb[10].mxu0  ;;  %v568_v7 = vmul.f32 0.044715, %v2179_v44  ;;  %v567_v8 = vmul.f32 0.044715, %v2182_v45  ;;  %v2220_v12 = vmul.f32 %v565_v49, %v2162_v26  ;;  %v745_v17 = vadd.f32 %v681_v57, %v2105_v42 }
 0x143   :  { %v2209_v62 = vadd.f32 %v260_v55, %v2093_v25  ;;  %v421_v63 = vpop.f32.mrb[10].mxu1  ;;  %v262_v2 = vpop.f32.mrb[11].mxu0  ;;  %v569_v14 = vmul.f32 0.044715, %v2189_v50  ;;  %v2232_v23 = vmul.f32 0.5, %v2114_v52  ;;  %v683_v31 = vmul.f32 %v619_v29, %v2114_v52 }
 0x144   :  { %v2217_v10 = vadd.f32 %v421_v63, %v2095_v27  ;;  %v423_v11 = vpop.f32.mrb[11].mxu1  ;;  %v2224_v16 = vadd.f32 %v262_v2, %v2097_v28  ;;  %v2236_v34 = vmul.f32 %v566_v60, %v2175_v38  ;;  %v809_v40 = vmul.f32 0.7978846, %v745_v17 }
 0x145   :  { %2963 = vst [vmem:[#allocation14_spill] sm:$0xff] %v2209_v62  ;;  %v570_v18 = vmul.f32 0.044715, %v2209_v62  ;;  %v2229_v20 = vadd.f32 %v423_v11, %v2100_v33  ;;  %v1756_v32 = vpop.eup %1755  ;;  %v2243_v41 = vmul.f32 %v568_v7, %v2179_v44  ;;  %v2246_v46 = vmul.f32 %v567_v8, %v2182_v45 }
 0x146   :  { %2964 = vst [vmem:[#allocation15_spill] sm:$0xff] %v2217_v10  ;;  %2965 = vst [vmem:[#allocation16_spill] sm:$0xff] %v2224_v16  ;;  %v266_v22 = vpop.f32.mrb[12].mxu0  ;;  %v572_v36 = vmul.f32 0.044715, %v2217_v10  ;;  %v2255_v57 = vmul.f32 %v569_v14, %v2189_v50  ;;  %1761 = vtanh.f32 %v809_v40  ;;  %v934_v17 = vadd.f32 1.0, %v1756_v32 }
 0x147   :  { %2966 = vst [vmem:[#allocation17_spill] sm:$0xff] %v2236_v34  ;;  %v2240_v37 = vadd.f32 %v266_v22, %v2093_v25  ;;  %v427_v42 = vpop.f32.mrb[12].mxu1  ;;  %v268_v39 = vpop.f32.mrb[13].mxu0  ;;  %2967 = vst [vmem:[#allocation18_spill] sm:$0xff] %v2243_v41  ;;  %v571_v60 = vmul.f32 0.044715, %v2224_v16  ;;  %v2262_v7 = vmul.f32 %v570_v18, %v2209_v62  ;;  %v747_v22 = vadd.f32 %v683_v31, %v2114_v52 }
 0x148   :  { %v2249_v29 = vadd.f32 %v427_v42, %v2095_v27  ;;  %v2252_v49 = vadd.f32 %v268_v39, %v2097_v28  ;;  %v429_v55 = vpop.f32.mrb[13].mxu1  ;;  %2969 = vst [vmem:[#allocation20_spill] sm:$0xff] %v2255_v57  ;;  %v1758_v2 = vpop.eup %1757  ;;  %v573_v8 = vmul.f32 0.044715, %v2229_v20  ;;  %v2267_v14 = vmul.f32 %v572_v36, %v2217_v10 }
 0x149   :  { %v2259_v63 = vadd.f32 %v429_v55, %v2100_v33  ;;  %2970 = vst [vmem:[#allocation21_spill] sm:$0xff] %v2262_v7  ;;  %v1760_v42 = vpop.eup %1759  ;;  %v574_v39 = vmul.f32 0.044715, %v2240_v37  ;;  %v935_v44 = vadd.f32 1.0, %v1758_v2  ;;  %v2282_v36 = vmul.f32 %v571_v60, %v2224_v16 }
 0x14a   :  { %2968 = vst [vmem:[#allocation19_spill] sm:$0xff] %v2249_v29  ;;  %v272_v11 = vpop.f32.mrb[14].mxu0  ;;  %2971 = vst [vmem:[#allocation22_spill] sm:$0xff] %v2267_v14  ;;  %v576_v18 = vmul.f32 0.044715, %v2249_v29  ;;  %v936_v34 = vadd.f32 1.0, %v1760_v42  ;;  %v2293_v38 = vmul.f32 %v573_v8, %v2229_v20 }
 0x14b   :  { %v2271_v55 = vadd.f32 %v272_v11, %v2093_v25  ;;  %v433_v40 = vpop.f32.mrb[14].mxu1  ;;  %v274_v41 = vpop.f32.mrb[15].mxu0  ;;  %v575_v7 = vmul.f32 0.044715, %v2252_v49  ;;  %2974 = vst [vmem:[#allocation25_spill] sm:$0xff] %v2282_v36  ;;  %v999_v2 = vmul.f32 %v935_v44, %v2135_v6  ;;  %v2296_v60 = vmul.f32 %v574_v39, %v2240_v37 }
 0x14c   :  { %v2276_v32 = vadd.f32 %v433_v40, %v2095_v27  ;;  %v2279_v52 = vadd.f32 %v274_v41, %v2097_v28  ;;  %v435_v31 = vpop.f32.mrb[15].mxu1  ;;  %v577_v11 = vmul.f32 0.044715, %v2259_v63  ;;  %v998_v40 = vmul.f32 %v934_v17, %v2124_v61 }
 0x14d   :  { %2972 = vst [vmem:[#allocation23_spill] sm:$0xff] %v2271_v55  ;;  %v2286_v14 = vadd.f32 %v435_v31, %v2100_v33  ;;  %v578_v10 = vmul.f32 0.044715, %v2271_v55  ;;  %1197 = vmatprep.mubr.f32.mxu0 %v999_v2  ;;  %v811_v6 = vmul.f32 0.7978846, %v747_v22  ;;  %v2300_v44 = vmul.f32 %v576_v18, %v2249_v29 }
 0x14e   :  { %2973 = vst [vmem:[#allocation24_spill] sm:$0xff] %v2276_v32  ;;  %v580_v62 = vmul.f32 0.044715, %v2276_v32  ;;  %v278_v41 = vpop.f32.mrb[16].mxu0  ;;  %v579_v36 = vmul.f32 0.044715, %v2279_v52  ;;  %v2303_v57 = vmul.f32 %v575_v7, %v2252_v49  ;;  %1198 = vmatmul.mubr.f32.vlgmr.msra.gmra.mrb[32].mxu0 %v998_v40  ;;  %v2310_v42 = vmul.f32 %v577_v11, %v2259_v63 }
 0x14f   :  { %2975 = vst [vmem:[#allocation26_spill] sm:$0xff] %v2286_v14  ;;  %v439_v31 = vpop.f32.mrb[16].mxu1  ;;  %v280_v16 = vpop.f32.mrb[17].mxu0  ;;  %2976 = vst [vmem:[#allocation27_spill] sm:$0xff] %v2300_v44  ;;  %v581_v61 = vmul.f32 0.044715, %v2286_v14  ;;  %v2307_v8 = vadd.f32 %v278_v41, %v2093_v25  ;;  %1763 = vtanh.f32 %v811_v6  ;;  %v1000_v7 = vmul.f32 %v936_v34, %v2130_v4 }
 0x150   :  { %v441_v17 = vpop.f32.mrb[17].mxu1  ;;  %v2313_v39 = vadd.f32 %v439_v31, %v2095_v27  ;;  %v2316_v22 = vadd.f32 %v280_v16, %v2097_v28  ;;  %v2323_v2 = vmul.f32 0.5, %v2117_v53  ;;  %v685_v40 = vmul.f32 %v2166_v30, %v2117_v53  ;;  %v1762_v41 = vpop.eup %1761 }
 0x151   :  { %2977 = vst [vmem:[#allocation28_spill] sm:$0xff] %v2307_v8  ;;  %v2320_v18 = vadd.f32 %v441_v17, %v2100_v33  ;;  %v2328_v31 = vmul.f32 %v578_v10, %v2271_v55  ;;  %v2331_v16 = vmul.f32 %v580_v62, %v2276_v32  ;;  %v2334_v6 = vmul.f32 %v579_v36, %v2279_v52 }
 0x152   :  { %2978 = vst [vmem:[#allocation29_spill] sm:$0xff] %v2313_v39  ;;  %v284_v11 = vpop.f32.mrb[18].mxu0  ;;  %v682_v4 = vmul.f32 %v2144_v13, %v2108_v43  ;;  %v2339_v44 = vmul.f32 %v581_v61, %v2286_v14  ;;  %v937_v30 = vadd.f32 1.0, %v1762_v41  ;;  %v582_v29 = vmul.f32 0.044715, %v2307_v8 }
 0x153   :  { %2979 = vst [vmem:[#allocation30_spill] sm:$0xff] %v2320_v18  ;;  %2980 = vst [vmem:[#allocation31_spill] sm:$0xff] %v2328_v31  ;;  %v445_v34 = vpop.f32.mrb[18].mxu1  ;;  %v286_v17 = vpop.f32.mrb[19].mxu0  ;;  %v749_v10 = vadd.f32 %v685_v40, %v2117_v53  ;;  %v584_v62 = vmul.f32 0.044715, %v2313_v39  ;;  %v684_v13 = vmul.f32 %v2151_v19, %v2111_v48  ;;  %v2351_v41 = vadd.f32 %v284_v11, %v2093_v25 }
 0x154   :  { %2981 = vst [vmem:[#allocation32_spill] sm:$0xff] %v2331_v16  ;;  %2982 = vst [vmem:[#allocation33_spill] sm:$0xff] %v2334_v6  ;;  %v447_v31 = vpop.f32.mrb[19].mxu1  ;;  %v583_v16 = vmul.f32 0.044715, %v2316_v22  ;;  %v746_v36 = vadd.f32 %v682_v4, %v2108_v43  ;;  %v1001_v32 = vmul.f32 %v937_v30, %v2198_v56  ;;  %v2355_v14 = vadd.f32 %v445_v34, %v2095_v27 }
 0x155   :  { %2983 = vst [vmem:[#allocation34_spill] sm:$0xff] %v2339_v44  ;;  %v585_v61 = vmul.f32 0.044715, %v2320_v18  ;;  %v813_v55 = vmul.f32 0.7978846, %v749_v10  ;;  %2984 = vst [vmem:[#allocation35_spill] sm:$0xff] %v2351_v41  ;;  %v748_v40 = vadd.f32 %v684_v13, %v2111_v48  ;;  %v2358_v4 = vadd.f32 %v286_v17, %v2097_v28 }
 0x156   :  { %v290_v44 = vpop.f32.mrb[20].mxu0  ;;  %v810_v53 = vmul.f32 0.7978846, %v746_v36  ;;  %2985 = vst [vmem:[#allocation36_spill] sm:$0xff] %v2355_v14  ;;  %1342 = vmatprep.mubr.f32.mxu1 %v1001_v32  ;;  %v2361_v56 = vmul.f32 %v582_v29, %v2307_v8  ;;  %v2364_v11 = vmul.f32 0.5, %v2108_v43  ;;  %v2367_v30 = vmul.f32 0.5, %v2111_v48 }
 0x157   :  { %2986 = vst [vmem:[#allocation37_spill] sm:$0xff] %v2358_v4  ;;  %v451_v6 = vpop.f32.mrb[20].mxu1  ;;  %v292_v19 = vpop.f32.mrb[21].mxu0  ;;  %1765 = vtanh.f32 %v813_v55  ;;  %1343 = vmatmul.mubr.f32.vlgmr.msra.gmra.mrb[32].mxu1 %v1000_v7  ;;  %v2370_v34 = vmul.f32 %v584_v62, %v2313_v39  ;;  %v812_v17 = vmul.f32 0.7978846, %v748_v40  ;;  %v2373_v36 = vadd.f32 %v447_v31, %v2100_v33 }
 0x158   :  { %2987 = vst [vmem:[#allocation38_spill] sm:$0xff] %v2361_v56  ;;  %v453_v10 = vpop.f32.mrb[21].mxu1  ;;  %1767 = vtanh.f32 %v810_v53  ;;  %v2376_v29 = vmul.f32 %v583_v16, %v2316_v22  ;;  %v2379_v55 = vmul.f32 %v585_v61, %v2320_v18  ;;  %v586_v43 = vmul.f32 0.044715, %v2351_v41 }
 0x159   :  { %2988 = vst [vmem:[#allocation39_spill] sm:$0xff] %v2370_v34  ;;  %2989 = vst [vmem:[#allocation40_spill] sm:$0xff] %v2373_v36  ;;  %v687_v48 = vmul.f32 %v2192_v51, %v2133_v5  ;;  %v1764_v7 = vpop.eup %1763  ;;  %1769 = vtanh.f32 %v812_v17  ;;  %v588_v62 = vmul.f32 0.044715, %v2355_v14  ;;  %v587_v31 = vmul.f32 0.044715, %v2358_v4 }
 0x15a   :  { %2990 = vst [vmem:[#allocation41_spill] sm:$0xff] %v2379_v55  ;;  %v2384_v32 = vpop.f32.mrb[22].mxu0  ;;  %v689_v16 = vmul.f32 %v2195_v54, %v2140_v9  ;;  %v939_v53 = vadd.f32 1.0, %v1764_v7  ;;  %v2395_v40 = vmul.f32 0.5, %v2133_v5  ;;  %v686_v17 = vmul.f32 %v2170_v35, %v2122_v0 }
 0x15b   :  { %v2390_v13 = vpop.f32.mrb[22].mxu1  ;;  %v2392_v61 = vpop.f32.mrb[23].mxu0  ;;  %v751_v51 = vadd.f32 %v687_v48, %v2133_v5  ;;  %v589_v39 = vmul.f32 0.044715, %v2373_v36  ;;  %v688_v54 = vmul.f32 %v2185_v47, %v2128_v1  ;;  %v2407_v8 = vadd.f32 %v290_v44, %v2093_v25 }
 0x15c   :  { %v2400_v34 = vpop.f32.mrb[23].mxu1  ;;  %v753_v56 = vadd.f32 %v689_v16, %v2140_v9  ;;  %v1003_v7 = vmul.f32 %v939_v53, %v2232_v23  ;;  %v750_v5 = vadd.f32 %v686_v17, %v2122_v0  ;;  %v2412_v48 = vadd.f32 %v451_v6, %v2095_v27 }
 0x15d   :  { %2991 = vst [vmem:[#allocation42_spill] sm:$0xff] %v2407_v8  ;;  %v815_v55 = vmul.f32 0.7978846, %v751_v51  ;;  %v2417_v18 = vmul.f32 %v586_v43, %v2351_v41  ;;  %v2420_v16 = vmul.f32 %v588_v62, %v2355_v14  ;;  %v752_v44 = vadd.f32 %v688_v54, %v2128_v1 }
 0x15e   :  { %2992 = vst [vmem:[#allocation43_spill] sm:$0xff] %v2412_v48  ;;  %v2414_v35 = vpop.f32.mrb[24].mxu0  ;;  %v817_v47 = vmul.f32 0.7978846, %v753_v56  ;;  %1202 = vmatprep.mubr.f32.mxu0 %v1003_v7  ;;  %v2424_v23 = vmul.f32 %v587_v31, %v2358_v4  ;;  %v814_v53 = vmul.f32 0.7978846, %v750_v5  ;;  %v2427_v6 = vadd.f32 %v292_v19, %v2097_v28 }
 0x15f   :  { %2993 = vst [vmem:[#allocation44_spill] sm:$0xff] %v2417_v18  ;;  %2994 = vst [vmem:[#allocation45_spill] sm:$0xff] %v2420_v16  ;;  %1771 = vtanh.f32 %v815_v55  ;;  %v2429_v51 = vpop.f32.mrb[24].mxu1  ;;  %v2431_v17 = vpop.f32.mrb[25].mxu0  ;;  %v2434_v43 = vmul.f32 0.5, %v2140_v9  ;;  %v2440_v55 = vmul.f32 %v589_v39, %v2373_v36  ;;  %v2443_v19 = vmul.f32 0.5, %v2122_v0 }
 0x160   :  { %2995 = vst [vmem:[#allocation46_spill] sm:$0xff] %v2424_v23  ;;  %1773 = vtanh.f32 %v817_v47  ;;  %v816_v56 = vmul.f32 0.7978846, %v752_v44  ;;  %v590_v62 = vmul.f32 0.044715, %v2407_v8  ;;  %v2437_v54 = vpop.f32.mrb[25].mxu1  ;;  %v2449_v47 = vadd.f32 %v453_v10, %v2100_v33 }
 0x161   :  { %v1766_v31 = vpop.eup %1765  ;;  %2996 = vst [vmem:[#allocation47_spill] sm:$0xff] %v2440_v55  ;;  %1775 = vtanh.f32 %v814_v53  ;;  %v592_v7 = vmul.f32 0.044715, %v2412_v48  ;;  %v691_v44 = vmul.f32 %v2212_v3, %v2159_v24  ;;  %v2458_v53 = vmul.f32 0.5, %v2128_v1 }
 0x162   :  { %v2446_v5 = vpop.f32.mrb[26].mxu0  ;;  %v1768_v9 = vpop.eup %1767  ;;  %v941_v16 = vadd.f32 1.0, %v1766_v31  ;;  %1777 = vtanh.f32 %v816_v56  ;;  %2997 = vst [vmem:[#allocation48_spill] sm:$0xff] %v2449_v47  ;;  %v591_v18 = vmul.f32 0.044715, %v2427_v6  ;;  %v693_v31 = vmul.f32 %v2220_v12, %v2162_v26 }
 0x163   :  { %v2453_v14 = vpop.f32.mrb[26].mxu1  ;;  %v2455_v39 = vpop.f32.mrb[27].mxu0  ;;  %v938_v0 = vadd.f32 1.0, %v1768_v9  ;;  %v2467_v3 = vmul.f32 %v590_v62, %v2407_v8  ;;  %v755_v55 = vadd.f32 %v691_v44, %v2159_v24  ;;  %v690_v9 = vmul.f32 %v2202_v58, %v2148_v15 }
 0x164   :  { %v2463_v56 = vpop.f32.mrb[27].mxu1  ;;  %v1770_v10 = vpop.eup %1769  ;;  %v1005_v41 = vmul.f32 %v941_v16, %v2323_v2  ;;  %v757_v23 = vadd.f32 %v693_v31, %v2162_v26  ;;  %v692_v12 = vmul.f32 %v2205_v59, %v2155_v21  ;;  %v2479_v2 = vmul.f32 %v592_v7, %v2412_v48 }
 0x165   :  { %2998 = vst [vmem:[#allocation49_spill] sm:$0xff] %v2467_v3  ;;  %v1002_v1 = vmul.f32 %v938_v0, %v2364_v11  ;;  %v940_v36 = vadd.f32 1.0, %v1770_v10  ;;  %v593_v16 = vmul.f32 0.044715, %v2449_v47  ;;  %v819_v62 = vmul.f32 0.7978846, %v755_v55 }
 0x166   :  { %v2476_v4 = vpop.f32.mrb[28].mxu0  ;;  %1347 = vmatprep.mubr.f32.mxu1 %v1005_v41  ;;  %2999 = vst [vmem:[#allocation50_spill] sm:$0xff] %v2479_v2  ;;  %v754_v44 = vadd.f32 %v690_v9, %v2148_v15  ;;  %v821_v31 = vmul.f32 0.7978846, %v757_v23  ;;  %v756_v59 = vadd.f32 %v692_v12, %v2155_v21  ;;  %v2491_v41 = vadd.f32 %v2384_v32, %v2093_v25 }
 0x167   :  { %v2483_v58 = vpop.f32.mrb[28].mxu1  ;;  %v2485_v11 = vpop.f32.mrb[29].mxu0  ;;  %1203 = vmatmul.mubr.f32.gmra.mrb[34].mxu0 %v1002_v1  ;;  %v1004_v0 = vmul.f32 %v940_v36, %v2367_v30  ;;  %v2496_v55 = vmul.f32 %v591_v18, %v2427_v6  ;;  %1779 = vtanh.f32 %v819_v62  ;;  %v2500_v9 = vadd.f32 %v2390_v13, %v2095_v27 }
 0x168   :  { %v2493_v7 = vpop.f32.mrb[29].mxu1  ;;  %v818_v10 = vmul.f32 0.7978846, %v754_v44  ;;  %v2503_v30 = vmul.f32 0.5, %v2159_v24  ;;  %1781 = vtanh.f32 %v821_v31  ;;  %v820_v36 = vmul.f32 0.7978846, %v756_v59 }
 0x169   :  { %3000 = vst [vmem:[#allocation51_spill] sm:$0xff] %v2496_v55  ;;  %3001 = vst [vmem:[#allocation52_spill] sm:$0xff] %v2500_v9  ;;  %v1772_v1 = vpop.eup %1771  ;;  %1348 = vmatmul.mubr.f32.gmra.mrb[34].mxu1 %v1004_v0  ;;  %v2507_v32 = vadd.f32 %v2392_v61, %v2097_v28  ;;  %v2512_v62 = vmul.f32 %v593_v16, %v2449_v47  ;;  %v501_v13 = vmul.f32 0.5, %v2162_v26  ;;  %v594_v61 = vmul.f32 0.044715, %v2491_v41  ;;  %v3006_v47 = vld [vmem:[#allocation13_spill] sm:$0xff] }
 0x16a   :  { %v2509_v23 = vpop.f32.mrb[30].mxu0  ;;  %v1774_v18 = vpop.eup %1773  ;;  %v943_v12 = vadd.f32 1.0, %v1772_v1  ;;  %1783 = vtanh.f32 %v818_v10  ;;  %v2522_v59 = vadd.f32 %v2400_v34, %v2100_v33  ;;  %v596_v10 = vmul.f32 0.044715, %v2500_v9  ;;  %v3007_v55 = vld [vmem:[#allocation18_spill] sm:$0xff] }
 0x16b   :  { %3002 = vst [vmem:[#allocation53_spill] sm:$0xff] %v2512_v62  ;;  %v2515_v44 = vpop.f32.mrb[30].mxu1  ;;  %v2517_v24 = vpop.f32.mrb[31].mxu0  ;;  %v945_v31 = vadd.f32 1.0, %v1774_v18  ;;  %1785 = vtanh.f32 %v820_v36  ;;  %v695_v48 = vmul.f32 %v2246_v46, %v2182_v45  ;;  %v498_v3 = vmul.f32 0.5, %v2148_v15 }
 0x16c   :  { %v1776_v0 = vpop.eup %1775  ;;  %v2524_v1 = vpop.f32.mrb[31].mxu1  ;;  %v1007_v2 = vmul.f32 %v943_v12, %v2395_v40  ;;  %v595_v8 = vmul.f32 0.044715, %v2507_v32  ;;  %v500_v62 = vmul.f32 0.5, %v2155_v21  ;;  %v3003_v12 = vld [vmem:[#allocation20_spill] sm:$0xff]  ;;  %v2548_v21 = vmul.f32 %v596_v10, %v2500_v9 }
 0x16d   :  { %v1778_v16 = vpop.eup %1777  ;;  %v942_v26 = vadd.f32 1.0, %v1776_v0  ;;  %v1009_v18 = vmul.f32 %v945_v31, %v2434_v43  ;;  %v759_v40 = vadd.f32 %v695_v48, %v2182_v45  ;;  %v697_v0 = vmul.f32 %v3003_v12, %v2189_v50  ;;  %v3004_v31 = vld [vmem:[#allocation12_spill] sm:$0xff] }
 0x16e   :  { %v944_v36 = vadd.f32 1.0, %v1778_v16  ;;  %1207 = vmatprep.mubr.f32.mxu0 %v1007_v2  ;;  %v597_v43 = vmul.f32 0.044715, %v2522_v59  ;;  %v3005_v16 = vld [vmem:[#allocation17_spill] sm:$0xff]  ;;  %v696_v2 = vmul.f32 %v3007_v55, %v3006_v47  ;;  %3008 = vst [vmem:[#allocation20_spill] sm:$0xff] %v2548_v21  ;;  %v2558_v55 = vadd.f32 %v2414_v35, %v2093_v25 }
 0x16f   :  { %v1006_v34 = vmul.f32 %v942_v26, %v2443_v19  ;;  %1352 = vmatprep.mubr.f32.mxu1 %v1009_v18  ;;  %v694_v15 = vmul.f32 %v3005_v16, %v3004_v31  ;;  %v2545_v19 = vmul.f32 %v594_v61, %v2491_v41  ;;  %v823_v48 = vmul.f32 0.7978846, %v759_v40  ;;  %v3010_v21 = vld [vmem:[#allocation25_spill] sm:$0xff] }
 0x170   :  { %v1008_v46 = vmul.f32 %v944_v36, %v2458_v53  ;;  %v761_v26 = vadd.f32 %v697_v0, %v2189_v50  ;;  %v2552_v53 = vmul.f32 %v595_v8, %v2507_v32  ;;  %v760_v36 = vadd.f32 %v696_v2, %v3006_v47 }
 0x171   :  { %1208 = vmatmul.mubr.f32.gmra.mrb[36].mxu0 %v1006_v34  ;;  %v758_v18 = vadd.f32 %v694_v15, %v3004_v31  ;;  %v1780_v61 = vpop.eup %1779  ;;  %v503_v34 = vmul.f32 0.5, %v2182_v45  ;;  %1787 = vtanh.f32 %v823_v48  ;;  %v2563_v40 = vadd.f32 %v2429_v51, %v2095_v27 }
 0x172   :  { %1353 = vmatmul.mubr.f32.gmra.mrb[36].mxu1 %v1008_v46  ;;  %v825_v10 = vmul.f32 0.7978846, %v761_v26  ;;  %v1782_v12 = vpop.eup %1781  ;;  %v947_v8 = vadd.f32 1.0, %v1780_v61  ;;  %v2566_v0 = vmul.f32 %v597_v43, %v2522_v59  ;;  %v824_v16 = vmul.f32 0.7978846, %v760_v36 }
 0x173   :  { %v822_v46 = vmul.f32 0.7978846, %v758_v18  ;;  %v949_v2 = vadd.f32 1.0, %v1782_v12  ;;  %v2570_v35 = vadd.f32 %v2431_v17, %v2097_v28  ;;  %v2574_v45 = vadd.f32 %v2437_v54, %v2100_v33  ;;  %v3009_v54 = vld [vmem:[#allocation16_spill] sm:$0xff] }
 0x174   :  { %v1784_v15 = vpop.eup %1783  ;;  %1789 = vtanh.f32 %v825_v10  ;;  %v1011_v48 = vmul.f32 %v947_v8, %v2503_v30  ;;  %v598_v43 = vmul.f32 0.044715, %v2558_v55  ;;  %v600_v61 = vmul.f32 0.044715, %v2563_v40 }
 0x175   :  { %v1786_v51 = vpop.eup %1785  ;;  %v946_v26 = vadd.f32 1.0, %v1784_v15  ;;  %1791 = vtanh.f32 %v822_v46  ;;  %v1013_v18 = vmul.f32 %v949_v2, %v501_v13  ;;  %v505_v17 = vmul.f32 0.5, %v2189_v50  ;;  %v3014_v2 = vld [vmem:[#allocation22_spill] sm:$0xff] }
 0x176   :  { %v948_v36 = vadd.f32 1.0, %v1786_v51  ;;  %1793 = vtanh.f32 %v824_v16  ;;  %1212 = vmatprep.mubr.f32.mxu0 %v1011_v48  ;;  %v502_v12 = vmul.f32 0.5, %v3004_v31  ;;  %v699_v9 = vmul.f32 %v3010_v21, %v3009_v54  ;;  %v3011_v31 = vld [vmem:[#allocation14_spill] sm:$0xff]  ;;  %v3012_v16 = vld [vmem:[#allocation21_spill] sm:$0xff]  ;;  %v3013_v21 = vld [vmem:[#allocation15_spill] sm:$0xff] }
 0x177   :  { %v1010_v10 = vmul.f32 %v946_v26, %v498_v3  ;;  %1357 = vmatprep.mubr.f32.mxu1 %v1013_v18  ;;  %v504_v8 = vmul.f32 0.5, %v3006_v47  ;;  %v2585_v46 = vmul.f32 0.5, %v3009_v54  ;;  %v701_v13 = vmul.f32 %v2293_v38, %v2229_v20 }
 0x178   :  { %v1012_v30 = vmul.f32 %v948_v36, %v500_v62  ;;  %v2590_v3 = vmul.f32 %v598_v43, %v2558_v55  ;;  %v763_v50 = vadd.f32 %v699_v9, %v3009_v54  ;;  %v698_v15 = vmul.f32 %v3012_v16, %v3011_v31 }
 0x179   :  { %1213 = vmatmul.mubr.f32.gmra.mrb[38].mxu0 %v1010_v10  ;;  %v700_v62 = vmul.f32 %v3014_v2, %v3013_v21  ;;  %v2598_v47 = vmul.f32 %v600_v61, %v2563_v40  ;;  %v599_v51 = vmul.f32 0.044715, %v2570_v35  ;;  %v601_v38 = vmul.f32 0.044715, %v2574_v45 }
 0x17a   :  { %1358 = vmatmul.mubr.f32.gmra.mrb[38].mxu1 %v1012_v30  ;;  %v765_v48 = vadd.f32 %v701_v13, %v2229_v20  ;;  %v827_v26 = vmul.f32 0.7978846, %v763_v50  ;;  %v762_v43 = vadd.f32 %v698_v15, %v3011_v31  ;;  %v2607_v18 = vadd.f32 %v2446_v5, %v2093_v25 }
 0x17b   :  { %v764_v9 = vadd.f32 %v700_v62, %v3013_v21  ;;  %v1788_v36 = vpop.eup %1787  ;;  %v2611_v61 = vadd.f32 %v2453_v14, %v2095_v27  ;;  %v2615_v54 = vadd.f32 %v2455_v39, %v2097_v28  ;;  %v703_v30 = vmul.f32 %v2303_v57, %v2252_v49 }
 0x17c   :  { %v829_v10 = vmul.f32 0.7978846, %v765_v48  ;;  %v951_v13 = vadd.f32 1.0, %v1788_v36  ;;  %1795 = vtanh.f32 %v827_v26  ;;  %v826_v50 = vmul.f32 0.7978846, %v762_v43 }
 0x17d   :  { %3015 = vst [vmem:[#allocation12_spill] sm:$0xff] %v2611_v61  ;;  %v828_v16 = vmul.f32 0.7978846, %v764_v9  ;;  %v2620_v5 = vmul.f32 %v599_v51, %v2570_v35  ;;  %v2623_v2 = vmul.f32 %v601_v38, %v2574_v45  ;;  %v509_v14 = vmul.f32 0.5, %v2229_v20 }
 0x17e   :  { %v1790_v15 = vpop.eup %1789  ;;  %1797 = vtanh.f32 %v829_v10  ;;  %v1015_v39 = vmul.f32 %v951_v13, %v503_v34  ;;  %v2628_v57 = vadd.f32 %v2463_v56, %v2100_v33  ;;  %v602_v51 = vmul.f32 0.044715, %v2607_v18 }
 0x17f   :  { %v1792_v62 = vpop.eup %1791  ;;  %v953_v48 = vadd.f32 1.0, %v1790_v15  ;;  %1799 = vtanh.f32 %v826_v50  ;;  %v604_v9 = vmul.f32 0.044715, %v2611_v61  ;;  %v603_v20 = vmul.f32 0.044715, %v2615_v54 }
 0x180   :  { %v1794_v26 = vpop.eup %1793  ;;  %v950_v43 = vadd.f32 1.0, %v1792_v62  ;;  %1801 = vtanh.f32 %v828_v16  ;;  %1217 = vmatprep.mubr.f32.mxu0 %v1015_v39  ;;  %v767_v34 = vadd.f32 %v703_v30, %v2252_v49  ;;  %v506_v13 = vmul.f32 0.5, %v3011_v31  ;;  %v3018_v30 = vld [vmem:[#allocation27_spill] sm:$0xff] }
 0x181   :  { %v1017_v38 = vmul.f32 %v953_v48, %v505_v17  ;;  %v952_v36 = vadd.f32 1.0, %v1794_v26  ;;  %v508_v56 = vmul.f32 0.5, %v3013_v21  ;;  %v705_v50 = vmul.f32 %v2310_v42, %v2259_v63  ;;  %v3017_v21 = vld [vmem:[#allocation19_spill] sm:$0xff] }
 0x182   :  { %v1014_v10 = vmul.f32 %v950_v43, %v502_v12  ;;  %v605_v15 = vmul.f32 0.044715, %v2628_v57  ;;  %v831_v62 = vmul.f32 0.7978846, %v767_v34  ;;  %v702_v17 = vmul.f32 %v2296_v60, %v2240_v37 }
 0x183   :  { %1362 = vmatprep.mubr.f32.mxu1 %v1017_v38  ;;  %v1016_v16 = vmul.f32 %v952_v36, %v504_v8  ;;  %v2642_v39 = vmul.f32 %v602_v51, %v2607_v18  ;;  %v2645_v12 = vmul.f32 %v604_v9, %v2611_v61  ;;  %v769_v31 = vadd.f32 %v705_v50, %v2259_v63 }
 0x184   :  { %1218 = vmatmul.mubr.f32.gmra.mrb[40].mxu0 %v1014_v10  ;;  %v704_v42 = vmul.f32 %v3018_v30, %v3017_v21  ;;  %v2651_v8 = vmul.f32 %v603_v20, %v2615_v54  ;;  %1803 = vtanh.f32 %v831_v62  ;;  %v766_v48 = vadd.f32 %v702_v17, %v2240_v37 }
 0x185   :  { %3016 = vst [vmem:[#allocation17_spill] sm:$0xff] %v2645_v12  ;;  %1363 = vmatmul.mubr.f32.gmra.mrb[40].mxu1 %v1016_v16  ;;  %v2656_v60 = vadd.f32 %v2476_v4, %v2093_v25  ;;  %v511_v26 = vmul.f32 0.5, %v2252_v49  ;;  %v833_v43 = vmul.f32 0.7978846, %v769_v31  ;;  %v2662_v9 = vadd.f32 %v2483_v58, %v2095_v27  ;;  %v3019_v4 = vld [vmem:[#allocation33_spill] sm:$0xff]  ;;  %v3021_v12 = vld [vmem:[#allocation34_spill] sm:$0xff] }
 0x186   :  { %v768_v51 = vadd.f32 %v704_v42, %v3017_v21  ;;  %v1796_v38 = vpop.eup %1795  ;;  %v2665_v36 = vmul.f32 %v605_v15, %v2628_v57  ;;  %v830_v20 = vmul.f32 0.7978846, %v766_v48  ;;  %v2669_v34 = vadd.f32 %v2485_v11, %v2097_v28 }
 0x187   :  { %v707_v10 = vmul.f32 %v3019_v4, %v2279_v52  ;;  %v955_v50 = vadd.f32 1.0, %v1796_v38  ;;  %v513_v16 = vmul.f32 0.5, %v2259_v63  ;;  %1805 = vtanh.f32 %v833_v43 }
 0x188   :  { %v1798_v49 = vpop.eup %1797  ;;  %v832_v62 = vmul.f32 0.7978846, %v768_v51  ;;  %1807 = vtanh.f32 %v830_v20  ;;  %v606_v15 = vmul.f32 0.044715, %v2656_v60  ;;  %v2677_v31 = vadd.f32 %v2493_v7, %v2100_v33 }
 0x189   :  { %v1800_v58 = vpop.eup %1799  ;;  %v957_v17 = vadd.f32 1.0, %v1798_v49  ;;  %v1019_v30 = vmul.f32 %v955_v50, %v2585_v46  ;;  %v608_v48 = vmul.f32 0.044715, %v2662_v9  ;;  %v607_v43 = vmul.f32 0.044715, %v2669_v34  ;;  %v3020_v49 = vld [vmem:[#allocation26_spill] sm:$0xff] }
 0x18a   :  { %v1802_v11 = vpop.eup %1801  ;;  %v954_v42 = vadd.f32 1.0, %v1800_v58  ;;  %1809 = vtanh.f32 %v832_v62  ;;  %v771_v51 = vadd.f32 %v707_v10, %v2279_v52  ;;  %v510_v4 = vmul.f32 0.5, %v2240_v37  ;;  %v3023_v58 = vld [vmem:[#allocation31_spill] sm:$0xff] }
 0x18b   :  { %v1021_v38 = vmul.f32 %v957_v17, %v509_v14  ;;  %v956_v63 = vadd.f32 1.0, %v1802_v11  ;;  %1222 = vmatprep.mubr.f32.mxu0 %v1019_v30  ;;  %v512_v7 = vmul.f32 0.5, %v3017_v21  ;;  %v709_v61 = vmul.f32 %v3021_v12, %v3020_v49  ;;  %v3022_v14 = vld [vmem:[#allocation23_spill] sm:$0xff]  ;;  %v3024_v21 = vld [vmem:[#allocation24_spill] sm:$0xff] }
 0x18c   :  { %v1018_v20 = vmul.f32 %v954_v42, %v506_v13  ;;  %v609_v50 = vmul.f32 0.044715, %v2677_v31  ;;  %v835_v62 = vmul.f32 0.7978846, %v771_v51  ;;  %v706_v17 = vmul.f32 %v3023_v58, %v3022_v14  ;;  %v3025_v11 = vld [vmem:[#allocation32_spill] sm:$0xff] }
 0x18d   :  { %1367 = vmatprep.mubr.f32.mxu1 %v1021_v38  ;;  %v1020_v46 = vmul.f32 %v956_v63, %v508_v56  ;;  %v2691_v10 = vmul.f32 %v606_v15, %v2656_v60  ;;  %v2694_v13 = vmul.f32 %v608_v48, %v2662_v9  ;;  %v773_v37 = vadd.f32 %v709_v61, %v3020_v49 }
 0x18e   :  { %1223 = vmatmul.mubr.f32.gmra.mrb[42].mxu0 %v1018_v20  ;;  %v708_v12 = vmul.f32 %v3025_v11, %v3024_v21  ;;  %v1804_v30 = vpop.eup %1803  ;;  %v2700_v56 = vmul.f32 %v607_v43, %v2669_v34  ;;  %1811 = vtanh.f32 %v835_v62  ;;  %v770_v42 = vadd.f32 %v706_v17, %v3022_v14 }
 0x18f   :  { %1368 = vmatmul.mubr.f32.gmra.mrb[42].mxu1 %v1020_v46  ;;  %v2705_v15 = vadd.f32 %v2509_v23, %v2093_v25  ;;  %v959_v38 = vadd.f32 1.0, %v1804_v30  ;;  %v837_v48 = vmul.f32 0.7978846, %v773_v37  ;;  %v2710_v61 = vadd.f32 %v2515_v44, %v2095_v27 }
 0x190   :  { %v772_v63 = vadd.f32 %v708_v12, %v3024_v21  ;;  %v2713_v51 = vmul.f32 %v609_v50, %v2677_v31  ;;  %v834_v43 = vmul.f32 0.7978846, %v770_v42  ;;  %v2717_v20 = vadd.f32 %v2517_v24, %v2097_v28 }
 0x191   :  { %3026 = vst [vmem:[#allocation13_spill] sm:$0xff] %v2705_v15  ;;  %3027 = vst [vmem:[#allocation18_spill] sm:$0xff] %v2710_v61  ;;  %v711_v25 = vmul.f32 %v2376_v29, %v2316_v22  ;;  %v1806_v23 = vpop.eup %1805  ;;  %v1023_v46 = vmul.f32 %v959_v38, %v511_v26  ;;  %v515_v62 = vmul.f32 0.5, %v2279_v52  ;;  %1813 = vtanh.f32 %v837_v48  ;;  %v3029_v38 = vld [vmem:[#allocation30_spill] sm:$0xff]  ;;  %v3030_v48 = vld [vmem:[#allocation41_spill] sm:$0xff] }
 0x192   :  { %3028 = vst [vmem:[#allocation16_spill] sm:$0xff] %v2717_v20  ;;  %v836_v58 = vmul.f32 0.7978846, %v772_v63  ;;  %v1808_v17 = vpop.eup %1807  ;;  %v961_v27 = vadd.f32 1.0, %v1806_v23  ;;  %v517_v44 = vmul.f32 0.5, %v3020_v49  ;;  %1815 = vtanh.f32 %v834_v43  ;;  %v3032_v23 = vld [vmem:[#allocation28_spill] sm:$0xff] }
 0x193   :  { %v610_v50 = vmul.f32 0.044715, %v2705_v15  ;;  %1227 = vmatprep.mubr.f32.mxu0 %v1023_v46  ;;  %v958_v28 = vadd.f32 1.0, %v1808_v17  ;;  %v514_v24 = vmul.f32 0.5, %v3022_v14  ;;  %v612_v29 = vmul.f32 0.044715, %v2710_v61 }
 0x194   :  { %v1810_v37 = vpop.eup %1809  ;;  %1817 = vtanh.f32 %v836_v58  ;;  %v1025_v26 = vmul.f32 %v961_v27, %v513_v16  ;;  %v611_v52 = vmul.f32 0.044715, %v2717_v20  ;;  %v775_v12 = vadd.f32 %v711_v25, %v2316_v22  ;;  %v3033_v46 = vld [vmem:[#allocation38_spill] sm:$0xff]  ;;  %v3037_v17 = vld [vmem:[#allocation37_spill] sm:$0xff] }
 0x195   :  { %v960_v11 = vadd.f32 1.0, %v1810_v37  ;;  %v1022_v30 = vmul.f32 %v958_v28, %v510_v4  ;;  %v516_v49 = vmul.f32 0.5, %v3024_v21  ;;  %v2731_v42 = vadd.f32 %v2524_v1, %v2100_v33  ;;  %v3035_v33 = vld [vmem:[#allocation29_spill] sm:$0xff]  ;;  %v3036_v1 = vld [vmem:[#allocation39_spill] sm:$0xff]  ;;  %v3038_v27 = vld [vmem:[#allocation46_spill] sm:$0xff] }
 0x196   :  { %v713_v63 = vmul.f32 %v3030_v48, %v3029_v38  ;;  %1372 = vmatprep.mubr.f32.mxu1 %v1025_v26  ;;  %v2736_v43 = vmul.f32 %v610_v50, %v2705_v15  ;;  %v839_v16 = vmul.f32 0.7978846, %v775_v12  ;;  %v710_v58 = vmul.f32 %v3033_v46, %v3032_v23  ;;  %v3040_v26 = vld [vmem:[#allocation40_spill] sm:$0xff] }
 0x197   :  { %v1024_v14 = vmul.f32 %v960_v11, %v512_v7  ;;  %1228 = vmatmul.mubr.f32.gmra.mrb[44].mxu0 %v1022_v30  ;;  %v2741_v4 = vmul.f32 %v612_v29, %v2710_v61  ;;  %v712_v25 = vmul.f32 %v3036_v1, %v3035_v33  ;;  %v715_v37 = vmul.f32 %v3038_v27, %v3037_v17  ;;  %v3041_v11 = vld [vmem:[#allocation47_spill] sm:$0xff] }
 0x198   :  { %3031 = vst [vmem:[#allocation25_spill] sm:$0xff] %v2736_v43  ;;  %v777_v21 = vadd.f32 %v713_v63, %v3029_v38  ;;  %v1812_v7 = vpop.eup %1811  ;;  %v2749_v50 = vmul.f32 %v611_v52, %v2717_v20  ;;  %1819 = vtanh.f32 %v839_v16  ;;  %v774_v28 = vadd.f32 %v710_v58, %v3032_v23  ;;  %v3042_v27 = vld [vmem:[#allocation35_spill] sm:$0xff]  ;;  %v3043_v52 = vld [vmem:[#allocation44_spill] sm:$0xff] }
 0x199   :  { %3034 = vst [vmem:[#allocation14_spill] sm:$0xff] %v2741_v4  ;;  %1373 = vmatmul.mubr.f32.gmra.mrb[44].mxu1 %v1024_v14  ;;  %v717_v29 = vmul.f32 %v3041_v11, %v3040_v26  ;;  %v963_v12 = vadd.f32 1.0, %v1812_v7  ;;  %v776_v48 = vadd.f32 %v712_v25, %v3035_v33  ;;  %v779_v63 = vadd.f32 %v715_v37, %v3037_v17 }
 0x19a   :  { %3039 = vst [vmem:[#allocation21_spill] sm:$0xff] %v2749_v50  ;;  %v841_v30 = vmul.f32 0.7978846, %v777_v21  ;;  %v613_v46 = vmul.f32 0.044715, %v2731_v42  ;;  %v714_v4 = vmul.f32 %v3043_v52, %v3042_v27  ;;  %v3045_v50 = vld [vmem:[#allocation45_spill] sm:$0xff] }
 0x19b   :  { %v838_v1 = vmul.f32 0.7978846, %v774_v28  ;;  %v781_v14 = vadd.f32 %v717_v29, %v3040_v26  ;;  %v1814_v16 = vpop.eup %1813  ;;  %v1027_v61 = vmul.f32 %v963_v12, %v515_v62  ;;  %v840_v58 = vmul.f32 0.7978846, %v776_v48  ;;  %v3044_v29 = vld [vmem:[#allocation36_spill] sm:$0xff] }
 0x19c   :  { %1821 = vtanh.f32 %v841_v30  ;;  %v843_v43 = vmul.f32 0.7978846, %v779_v63  ;;  %v1816_v11 = vpop.eup %1815  ;;  %v965_v7 = vadd.f32 1.0, %v1814_v16  ;;  %v778_v25 = vadd.f32 %v714_v4, %v3042_v27 }
 0x19d   :  { %1823 = vtanh.f32 %v838_v1  ;;  %v845_v21 = vmul.f32 0.7978846, %v781_v14  ;;  %1232 = vmatprep.mubr.f32.mxu0 %v1027_v61  ;;  %v962_v15 = vadd.f32 1.0, %v1816_v11  ;;  %v519_v28 = vmul.f32 0.5, %v2316_v22  ;;  %v3046_v22 = vld [vmem:[#allocation51_spill] sm:$0xff]  ;;  %v3050_v14 = vld [vmem:[#allocation49_spill] sm:$0xff] }
 0x19e   :  { %v1818_v37 = vpop.eup %1817  ;;  %1825 = vtanh.f32 %v840_v58  ;;  %v716_v52 = vmul.f32 %v3045_v50, %v3044_v29  ;;  %v1029_v20 = vmul.f32 %v965_v7, %v517_v44  ;;  %v842_v12 = vmul.f32 0.7978846, %v778_v25  ;;  %v3047_v50 = vld [vmem:[#allocation48_spill] sm:$0xff]  ;;  %v3051_v11 = vld [vmem:[#allocation43_spill] sm:$0xff]  ;;  %v3052_v7 = vld [vmem:[#allocation50_spill] sm:$0xff] }
 0x19f   :  { %v964_v62 = vadd.f32 1.0, %v1818_v37  ;;  %1827 = vtanh.f32 %v843_v43  ;;  %v1026_v30 = vmul.f32 %v962_v15, %v514_v24  ;;  %v521_v48 = vmul.f32 0.5, %v3029_v38  ;;  %v3048_v15 = vld [vmem:[#allocation53_spill] sm:$0xff]  ;;  %v3049_v38 = vld [vmem:[#allocation42_spill] sm:$0xff] }
 0x1a0   :  { %1829 = vtanh.f32 %v845_v21  ;;  %v780_v63 = vadd.f32 %v716_v52, %v3044_v29  ;;  %1377 = vmatprep.mubr.f32.mxu1 %v1029_v20  ;;  %v2767_v61 = vmul.f32 %v613_v46, %v2731_v42  ;;  %v719_v1 = vmul.f32 %v3046_v22, %v2427_v6 }
 0x1a1   :  { %v1028_v4 = vmul.f32 %v964_v62, %v516_v49  ;;  %1831 = vtanh.f32 %v842_v12  ;;  %1233 = vmatmul.mubr.f32.gmra.mrb[46].mxu0 %v1026_v30  ;;  %v518_v44 = vmul.f32 0.5, %v3032_v23  ;;  %v721_v24 = vmul.f32 %v3048_v15, %v3047_v50 }
 0x1a2   :  { %v844_v43 = vmul.f32 0.7978846, %v780_v63  ;;  %v718_v16 = vmul.f32 %v3050_v14, %v3049_v38  ;;  %v1820_v58 = vpop.eup %1819  ;;  %v520_v20 = vmul.f32 0.5, %v3035_v33  ;;  %v523_v49 = vmul.f32 0.5, %v3037_v17 }
 0x1a3   :  { %1378 = vmatmul.mubr.f32.gmra.mrb[46].mxu1 %v1028_v4  ;;  %v783_v46 = vadd.f32 %v719_v1, %v2427_v6  ;;  %v720_v21 = vmul.f32 %v3052_v7, %v3051_v11  ;;  %v967_v25 = vadd.f32 1.0, %v1820_v58  ;;  %v785_v23 = vadd.f32 %v721_v24, %v3047_v50 }
 0x1a4   :  { %1833 = vtanh.f32 %v844_v43  ;;  %v782_v37 = vadd.f32 %v718_v16, %v3049_v38  ;;  %v525_v52 = vmul.f32 0.5, %v3040_v26  ;;  %v723_v33 = vmul.f32 %v2552_v53, %v2507_v32 }
 0x1a5   :  { %v847_v62 = vmul.f32 0.7978846, %v783_v46  ;;  %v784_v12 = vadd.f32 %v720_v21, %v3051_v11  ;;  %v1031_v30 = vmul.f32 %v967_v25, %v519_v28  ;;  %v849_v63 = vmul.f32 0.7978846, %v785_v23 }
 0x1a6   :  { %v1822_v17 = vpop.eup %1821  ;;  %v846_v4 = vmul.f32 0.7978846, %v782_v37  ;;  %v725_v22 = vmul.f32 %v2566_v0, %v2522_v59  ;;  %v787_v24 = vadd.f32 %v723_v33, %v2507_v32  ;;  %v522_v16 = vmul.f32 0.5, %v3042_v27 }
 0x1a7   :  { %v1824_v1 = vpop.eup %1823  ;;  %v969_v43 = vadd.f32 1.0, %v1822_v17  ;;  %1835 = vtanh.f32 %v847_v62  ;;  %v848_v15 = vmul.f32 0.7978846, %v784_v12  ;;  %1237 = vmatprep.mubr.f32.mxu0 %v1031_v30  ;;  %v722_v27 = vmul.f32 %v2545_v19, %v2491_v41 }
 0x1a8   :  { %v1826_v26 = vpop.eup %1825  ;;  %v966_v14 = vadd.f32 1.0, %v1824_v1  ;;  %1837 = vtanh.f32 %v849_v63  ;;  %v789_v53 = vadd.f32 %v725_v22, %v2522_v59  ;;  %v851_v7 = vmul.f32 0.7978846, %v787_v24  ;;  %v3054_v22 = vld [vmem:[#allocation20_spill] sm:$0xff] }
 0x1a9   :  { %v1828_v28 = vpop.eup %1827  ;;  %v1033_v58 = vmul.f32 %v969_v43, %v521_v48  ;;  %v968_v46 = vadd.f32 1.0, %v1826_v26  ;;  %1839 = vtanh.f32 %v846_v4  ;;  %v524_v48 = vmul.f32 0.5, %v3044_v29  ;;  %v3053_v4 = vld [vmem:[#allocation52_spill] sm:$0xff] }
 0x1aa   :  { %v1830_v0 = vpop.eup %1829  ;;  %v1030_v21 = vmul.f32 %v966_v14, %v518_v44  ;;  %v971_v25 = vadd.f32 1.0, %v1828_v28  ;;  %1841 = vtanh.f32 %v848_v15  ;;  %v853_v23 = vmul.f32 0.7978846, %v789_v53 }
 0x1ab   :  { %v1832_v37 = vpop.eup %1831  ;;  %1382 = vmatprep.mubr.f32.mxu1 %v1033_v58  ;;  %v1032_v62 = vmul.f32 %v968_v46, %v520_v20  ;;  %v973_v12 = vadd.f32 1.0, %v1830_v0  ;;  %1843 = vtanh.f32 %v851_v7  ;;  %v527_v44 = vmul.f32 0.5, %v2427_v6 }
 0x1ac   :  { %1238 = vmatmul.mubr.f32.gmra.mrb[48].mxu0 %v1030_v21  ;;  %v1035_v33 = vmul.f32 %v971_v25, %v523_v49  ;;  %v970_v17 = vadd.f32 1.0, %v1832_v37  ;;  %1845 = vtanh.f32 %v853_v23  ;;  %v786_v63 = vadd.f32 %v722_v27, %v2491_v41 }
 0x1ad   :  { %1383 = vmatmul.mubr.f32.gmra.mrb[48].mxu1 %v1032_v62  ;;  %v1037_v30 = vmul.f32 %v973_v12, %v525_v52  ;;  %v724_v20 = vmul.f32 %v3054_v22, %v3053_v4  ;;  %v529_v19 = vmul.f32 0.5, %v3047_v50  ;;  %v727_v49 = vmul.f32 %v2620_v5, %v2570_v35 }
 0x1ae   :  { %v1834_v1 = vpop.eup %1833  ;;  %1242 = vmatprep.mubr.f32.mxu0 %v1035_v33  ;;  %v1034_v43 = vmul.f32 %v970_v17, %v522_v16  ;;  %v729_v29 = vmul.f32 %v2623_v2, %v2574_v45  ;;  %v526_v6 = vmul.f32 0.5, %v3049_v38  ;;  %v850_v15 = vmul.f32 0.7978846, %v786_v63 }
 0x1af   :  { %1387 = vmatprep.mubr.f32.mxu1 %v1037_v30  ;;  %v972_v52 = vadd.f32 1.0, %v1834_v1  ;;  %v788_v24 = vadd.f32 %v724_v20, %v3053_v4  ;;  %v528_v26 = vmul.f32 0.5, %v3051_v11  ;;  %v791_v14 = vadd.f32 %v727_v49, %v2570_v35 }
 0x1b0   :  { %1243 = vmatmul.mubr.f32.gmra.mrb[50].mxu0 %v1034_v43  ;;  %v793_v50 = vadd.f32 %v729_v29, %v2574_v45  ;;  %v726_v5 = vmul.f32 %v2590_v3, %v2558_v55  ;;  %1847 = vtanh.f32 %v850_v15  ;;  %v728_v38 = vmul.f32 %v2598_v47, %v2563_v40 }
 0x1b1   :  { %v1836_v16 = vpop.eup %1835  ;;  %v1036_v53 = vmul.f32 %v972_v52, %v524_v48  ;;  %v852_v2 = vmul.f32 0.7978846, %v788_v24  ;;  %v855_v46 = vmul.f32 0.7978846, %v791_v14  ;;  %v531_v25 = vmul.f32 0.5, %v2507_v32 }
 0x1b2   :  { %v1838_v28 = vpop.eup %1837  ;;  %v975_v58 = vadd.f32 1.0, %v1836_v16  ;;  %v857_v7 = vmul.f32 0.7978846, %v793_v50  ;;  %v790_v11 = vadd.f32 %v726_v5, %v2558_v55  ;;  %v792_v3 = vadd.f32 %v728_v38, %v2563_v40 }
 0x1b3   :  { %v1840_v0 = vpop.eup %1839  ;;  %1388 = vmatmul.mubr.f32.gmra.mrb[50].mxu1 %v1036_v53  ;;  %v977_v21 = vadd.f32 1.0, %v1838_v28  ;;  %1849 = vtanh.f32 %v852_v2  ;;  %v731_v32 = vmul.f32 %v2651_v8, %v2615_v54  ;;  %v530_v43 = vmul.f32 0.5, %v2491_v41 }
 0x1b4   :  { %v1842_v23 = vpop.eup %1841  ;;  %v1039_v37 = vmul.f32 %v975_v58, %v527_v44  ;;  %v974_v62 = vadd.f32 1.0, %v1840_v0  ;;  %1851 = vtanh.f32 %v855_v46  ;;  %v854_v12 = vmul.f32 0.7978846, %v790_v11 }
 0x1b5   :  { %v1844_v47 = vpop.eup %1843  ;;  %v1041_v27 = vmul.f32 %v977_v21, %v529_v19  ;;  %v976_v33 = vadd.f32 1.0, %v1842_v23  ;;  %1853 = vtanh.f32 %v857_v7  ;;  %v856_v17 = vmul.f32 0.7978846, %v792_v3 }
 0x1b6   :  { %v1846_v48 = vpop.eup %1845  ;;  %1247 = vmatprep.mubr.f32.mxu0 %v1039_v37  ;;  %v1038_v30 = vmul.f32 %v974_v62, %v526_v6  ;;  %v979_v63 = vadd.f32 1.0, %v1844_v47  ;;  %1855 = vtanh.f32 %v854_v12  ;;  %v533_v44 = vmul.f32 0.5, %v2522_v59  ;;  %v3055_v6 = vld [vmem:[#allocation12_spill] sm:$0xff]  ;;  %v3056_v59 = vld [vmem:[#allocation17_spill] sm:$0xff] }
 0x1b7   :  { %1392 = vmatprep.mubr.f32.mxu1 %v1041_v27  ;;  %v1040_v22 = vmul.f32 %v976_v33, %v528_v26  ;;  %v981_v20 = vadd.f32 1.0, %v1846_v48  ;;  %1857 = vtanh.f32 %v856_v17  ;;  %v795_v19 = vadd.f32 %v731_v32, %v2615_v54  ;;  %v3058_v32 = vld [vmem:[#allocation21_spill] sm:$0xff] }
 0x1b8   :  { %1248 = vmatmul.mubr.f32.gmra.mrb[52].mxu0 %v1038_v30  ;;  %v1043_v1 = vmul.f32 %v979_v63, %v531_v25  ;;  %v733_v49 = vmul.f32 %v2665_v36, %v2628_v57  ;;  %v532_v52 = vmul.f32 0.5, %v3053_v4  ;;  %v730_v8 = vmul.f32 %v2642_v39, %v2607_v18  ;;  %v3057_v63 = vld [vmem:[#allocation16_spill] sm:$0xff] }
 0x1b9   :  { %1393 = vmatmul.mubr.f32.gmra.mrb[52].mxu1 %v1040_v22  ;;  %v1045_v29 = vmul.f32 %v981_v20, %v533_v44  ;;  %v732_v15 = vmul.f32 %v3056_v59, %v3055_v6  ;;  %v535_v24 = vmul.f32 0.5, %v2570_v35  ;;  %v859_v26 = vmul.f32 0.7978846, %v795_v19  ;;  %v3060_v19 = vld [vmem:[#allocation25_spill] sm:$0xff]  ;;  %v3062_v59 = vld [vmem:[#allocation14_spill] sm:$0xff] }
 0x1ba   :  { %1252 = vmatprep.mubr.f32.mxu0 %v1043_v1  ;;  %v797_v41 = vadd.f32 %v733_v49, %v2628_v57  ;;  %v735_v14 = vmul.f32 %v2700_v56, %v2669_v34  ;;  %v1848_v36 = vpop.eup %1847  ;;  %v537_v50 = vmul.f32 0.5, %v2574_v45  ;;  %v794_v4 = vadd.f32 %v730_v8, %v2607_v18  ;;  %v3061_v8 = vld [vmem:[#allocation18_spill] sm:$0xff] }
 0x1bb   :  { %1397 = vmatprep.mubr.f32.mxu1 %v1045_v29  ;;  %v796_v39 = vadd.f32 %v732_v15, %v3055_v6  ;;  %v737_v5 = vmul.f32 %v2713_v51, %v2677_v31  ;;  %v978_v16 = vadd.f32 1.0, %v1848_v36  ;;  %1859 = vtanh.f32 %v859_v26 }
 0x1bc   :  { %v861_v35 = vmul.f32 0.7978846, %v797_v41  ;;  %v799_v53 = vadd.f32 %v735_v14, %v2669_v34  ;;  %v534_v38 = vmul.f32 0.5, %v2558_v55  ;;  %v858_v56 = vmul.f32 0.7978846, %v794_v4 }
 0x1bd   :  { %v1850_v2 = vpop.eup %1849  ;;  %v860_v28 = vmul.f32 0.7978846, %v796_v39  ;;  %v801_v58 = vadd.f32 %v737_v5, %v2677_v31  ;;  %v1042_v46 = vmul.f32 %v978_v16, %v530_v43  ;;  %v734_v25 = vmul.f32 %v2691_v10, %v2656_v60  ;;  %v3059_v43 = vld [vmem:[#allocation13_spill] sm:$0xff] }
 0x1be   :  { %v1852_v45 = vpop.eup %1851  ;;  %v980_v7 = vadd.f32 1.0, %v1850_v2  ;;  %1861 = vtanh.f32 %v861_v35  ;;  %v863_v11 = vmul.f32 0.7978846, %v799_v53  ;;  %v536_v37 = vmul.f32 0.5, %v2563_v40 }
 0x1bf   :  { %v1854_v0 = vpop.eup %1853  ;;  %v983_v21 = vadd.f32 1.0, %v1852_v45  ;;  %1863 = vtanh.f32 %v858_v56  ;;  %v865_v51 = vmul.f32 0.7978846, %v801_v58  ;;  %1253 = vmatmul.mubr.f32.gmra.mrb[54].mxu0 %v1042_v46  ;;  %v798_v27 = vadd.f32 %v734_v25, %v2656_v60 }
 0x1c0   :  { %v1856_v3 = vpop.eup %1855  ;;  %v1044_v23 = vmul.f32 %v980_v7, %v532_v52  ;;  %v985_v55 = vadd.f32 1.0, %v1854_v0  ;;  %1865 = vtanh.f32 %v860_v28  ;;  %v736_v10 = vmul.f32 %v2694_v13, %v2662_v9 }
 0x1c1   :  { %v1858_v62 = vpop.eup %1857  ;;  %v1047_v12 = vmul.f32 %v983_v21, %v535_v24  ;;  %v982_v47 = vadd.f32 1.0, %v1856_v3  ;;  %1867 = vtanh.f32 %v863_v11  ;;  %v862_v30 = vmul.f32 0.7978846, %v798_v27 }
 0x1c2   :  { %1398 = vmatmul.mubr.f32.gmra.mrb[54].mxu1 %v1044_v23  ;;  %v1049_v33 = vmul.f32 %v985_v55, %v537_v50  ;;  %v984_v17 = vadd.f32 1.0, %v1858_v62  ;;  %1869 = vtanh.f32 %v865_v51  ;;  %v739_v40 = vmul.f32 %v3058_v32, %v3057_v63 }
 0x1c3   :  { %1257 = vmatprep.mubr.f32.mxu0 %v1047_v12  ;;  %v1046_v48 = vmul.f32 %v982_v47, %v534_v38  ;;  %v800_v44 = vadd.f32 %v736_v10, %v2662_v9  ;;  %v741_v20 = vmul.f32 %v2767_v61, %v2731_v42  ;;  %1871 = vtanh.f32 %v862_v30 }
 0x1c4   :  { %1402 = vmatprep.mubr.f32.mxu1 %v1049_v33  ;;  %v1048_v22 = vmul.f32 %v984_v17, %v536_v37  ;;  %v803_v1 = vadd.f32 %v739_v40, %v3057_v63  ;;  %v738_v13 = vmul.f32 %v3060_v19, %v3059_v43  ;;  %v740_v15 = vmul.f32 %v3062_v59, %v3061_v8 }
 0x1c5   :  { %1258 = vmatmul.mubr.f32.gmra.mrb[56].mxu0 %v1046_v48  ;;  %v1860_v49 = vpop.eup %1859  ;;  %v864_v29 = vmul.f32 0.7978846, %v800_v44  ;;  %v805_v52 = vadd.f32 %v741_v20, %v2731_v42  ;;  %v539_v24 = vmul.f32 0.5, %v2615_v54  ;;  %v541_v36 = vmul.f32 0.5, %v2628_v57 }
 0x1c6   :  { %1403 = vmatmul.mubr.f32.gmra.mrb[56].mxu1 %v1048_v22  ;;  %v987_v26 = vadd.f32 1.0, %v1860_v49  ;;  %v867_v41 = vmul.f32 0.7978846, %v803_v1  ;;  %v802_v61 = vadd.f32 %v738_v13, %v3059_v43  ;;  %v804_v4 = vadd.f32 %v740_v15, %v3061_v8  ;;  %v2874_v13 = vld [vmem:[%s2911_s4] ss:$0 sm:$0xff]  ;;  %s1985_s4 = smov [#allocation8]  }
 0x1c7   :  { %1873 = vtanh.f32 %v864_v29  ;;  %v869_v50 = vmul.f32 0.7978846, %v805_v52  ;;  %v538_v2 = vmul.f32 0.5, %v2607_v18  ;;  %v540_v57 = vmul.f32 0.5, %v3055_v6  ;;  %s1444_s8 = sshll.u32 %s1985_s4, 4  ;;  %s1445_s8 = int_to_ptr.vmem [resolvable:$true] %s1444_s8 }
 0x1c8   :  { %v1862_v14 = vpop.eup %1861  ;;  %v1051_v5 = vmul.f32 %v987_v26, %v539_v24  ;;  %1875 = vtanh.f32 %v867_v41  ;;  %v866_v35 = vmul.f32 0.7978846, %v802_v61  ;;  %v868_v38 = vmul.f32 0.7978846, %v804_v4  ;;  %s1949_s9 = scalar_lea.vmem %s1445_s8, 2048  ;;  %p1954_p11 = scmp.lt.s32.totalorder %s1445_s8, %s1445_s8 }
 0x1c9   :  { %v1864_v39 = vpop.eup %1863  ;;  %v989_v16 = vadd.f32 1.0, %v1862_v14  ;;  %1877 = vtanh.f32 %v869_v50  ;;  %v543_v7 = vmul.f32 0.5, %v2669_v34  ;;  %v545_v18 = vmul.f32 0.5, %v2677_v31  ;;  %p1950_p10 = scmp.ne.s32.totalorder %s1445_s8, %s1949_s9  ;;  %p1955_p12 = scmp.lt.s32.totalorder %s1949_s9, %s1949_s9 }
 0x1ca   :  { %v1866_v53 = vpop.eup %1865  ;;  %v986_v54 = vadd.f32 1.0, %v1864_v39  ;;  %1262 = vmatprep.mubr.f32.mxu0 %v1051_v5  ;;  %1879 = vtanh.f32 %v866_v35  ;;  %v542_v6 = vmul.f32 0.5, %v2656_v60  ;;  %v544_v62 = vmul.f32 0.5, %v2662_v9 }
 0x1cb   :  { %v1868_v56 = vpop.eup %1867  ;;  %v1053_v28 = vmul.f32 %v989_v16, %v541_v36  ;;  %v988_v58 = vadd.f32 1.0, %v1866_v53  ;;  %1881 = vtanh.f32 %v868_v38  ;;  %v547_v31 = vmul.f32 0.5, %v3057_v63  ;;  %p1956_p13 = por %p1955_p12, %p1954_p11 }
 0x1cc   :  { %v1870_v45 = vpop.eup %1869  ;;  %v1050_v46 = vmul.f32 %v986_v54, %v538_v2  ;;  %v991_v11 = vadd.f32 1.0, %v1868_v56  ;;  %v549_v10 = vmul.f32 0.5, %v2731_v42  ;;  %v546_v32 = vmul.f32 0.5, %v3059_v43 }
 0x1cd   :  { %1407 = vmatprep.mubr.f32.mxu1 %v1053_v28  ;;  %v1052_v0 = vmul.f32 %v988_v58, %v540_v57  ;;  %v993_v21 = vadd.f32 1.0, %v1870_v45  ;;  %v1872_v25 = vpop.eup %1871  ;;  %v548_v9 = vmul.f32 0.5, %v3061_v8  ;;  %p1957_p0 = pnand %p1956_p13, %p1950_p10 }
 0x1ce   :  { %1263 = vmatmul.mubr.f32.gmra.mrb[58].mxu0 %v1050_v46  ;;  %v1055_v51 = vmul.f32 %v991_v11, %v543_v7  ;;  %v990_v23 = vadd.f32 1.0, %v1872_v25 }
 0x1cf   :  { %1408 = vmatmul.mubr.f32.gmra.mrb[58].mxu1 %v1052_v0  ;;  %v1057_v3 = vmul.f32 %v993_v21, %v545_v18 }
 0x1d0   :  { %1267 = vmatprep.mubr.f32.mxu0 %v1055_v51  ;;  %v1054_v37 = vmul.f32 %v990_v23, %v542_v6 }
 0x1d1   :  { %1412 = vmatprep.mubr.f32.mxu1 %v1057_v3  ;;  %v1874_v55 = vpop.eup %1873 }
 0x1d2   :  { %v1876_v34 = vpop.eup %1875  ;;  %v992_v12 = vadd.f32 1.0, %v1874_v55  ;;  %1268 = vmatmul.mubr.f32.gmra.mrb[60].mxu0 %v1054_v37 }
 0x1d3   :  { %v1878_v47 = vpop.eup %1877  ;;  %v995_v27 = vadd.f32 1.0, %v1876_v34 }
 0x1d4   :  { %v1880_v33 = vpop.eup %1879  ;;  %v1056_v17 = vmul.f32 %v992_v12, %v544_v62  ;;  %v997_v48 = vadd.f32 1.0, %v1878_v47 }
 0x1d5   :  { %v1882_v30 = vpop.eup %1881  ;;  %v1059_v60 = vmul.f32 %v995_v27, %v547_v31  ;;  %v994_v40 = vadd.f32 1.0, %v1880_v33 }
 0x1d6   :  { %1413 = vmatmul.mubr.f32.gmra.mrb[60].mxu1 %v1056_v17  ;;  %v1061_v22 = vmul.f32 %v997_v48, %v549_v10  ;;  %v996_v44 = vadd.f32 1.0, %v1882_v30 }
 0x1d7   :  { %1272 = vmatprep.mubr.f32.mxu0 %v1059_v60  ;;  %v1058_v20 = vmul.f32 %v994_v40, %v546_v32 }
 0x1d8   :  { %1417 = vmatprep.mubr.f32.mxu1 %v1061_v22  ;;  %v1060_v63 = vmul.f32 %v996_v44, %v548_v9 }
 0x1d9   :  { %1273 = vmatmul.mubr.f32.gmra.mrb[62].mxu0 %v1058_v20 }
 0x1da   :  { %1418 = vmatmul.mubr.f32.gmra.mrb[62].mxu1 %v1060_v63 }
 0x221   :  { %v1490_v1 = vpop.f32.mrb[32].mxu0 }
 0x222   :  { %v1491_v19 = vpop.f32.mrb[33].mxu0 }
 0x223   :  { %v1492_v42 = vadd.f32 %v1491_v19, %v1490_v1 }
 0x225   :  { %v1200_v49 = vadd.f32 %v1492_v42, %v2874_v13 }
 0x22a   :  { %v1570_v43 = vpop.f32.mrb[32].mxu1 }
 0x22b   :  { %v1571_v29 = vpop.f32.mrb[33].mxu1 }
 0x22c   :  { %v1572_v52 = vadd.f32 %v1571_v29, %v1570_v43 }
 0x22e   :  { %v1345_v8 = vadd.f32 %v1572_v52, %v1200_v49 }
 0x230   :  { %1423 = vst [vmem:[#allocation8] sm:$0xff] %v1345_v8 }
 0x23a   :  { %v1493_v59 = vpop.f32.mrb[34].mxu0 }
 0x23b   :  { %v1494_v15 = vpop.f32.mrb[35].mxu0 }
 0x23c   :  { %v1573_v24 = vpop.f32.mrb[34].mxu1  ;;  %v1495_v26 = vadd.f32 %v1494_v15, %v1493_v59 }
 0x23d   :  { %v1574_v41 = vpop.f32.mrb[35].mxu1 }
 0x23e   :  { %v1205_v61 = vadd.f32 %v1495_v26, %v2874_v13  ;;  %v1575_v14 = vadd.f32 %v1574_v41, %v1573_v24 }
 0x240   :  { %v1350_v36 = vadd.f32 %v1575_v14, %v1205_v61 }
 0x242   :  { %1424 = vst [vmem:[#allocation8 + $0x8] sm:$0xff] %v1350_v36 }
 0x244   :  { %v1496_v50 = vpop.f32.mrb[36].mxu0 }
 0x245   :  { %v1576_v4 = vpop.f32.mrb[36].mxu1  ;;  %v1497_v39 = vpop.f32.mrb[37].mxu0 }
 0x246   :  { %v1498_v5 = vadd.f32 %v1497_v39, %v1496_v50  ;;  %v1577_v16 = vpop.f32.mrb[37].mxu1 }
 0x247   :  { %v1578_v35 = vadd.f32 %v1577_v16, %v1576_v4 }
 0x248   :  { %v1210_v53 = vadd.f32 %v1498_v5, %v2874_v13 }
 0x24a   :  { %v1355_v2 = vadd.f32 %v1578_v35, %v1210_v53 }
 0x24c   :  { %1425 = vst [vmem:[#allocation8 + $0x10] sm:$0xff] %v1355_v2  ;;  %v1499_v54 = vpop.f32.mrb[38].mxu0 }
 0x24d   :  { %v1579_v38 = vpop.f32.mrb[38].mxu1  ;;  %v1500_v56 = vpop.f32.mrb[39].mxu0 }
 0x24e   :  { %v1501_v28 = vadd.f32 %v1500_v56, %v1499_v54  ;;  %v1580_v57 = vpop.f32.mrb[39].mxu1 }
 0x24f   :  { %v1581_v58 = vadd.f32 %v1580_v57, %v1579_v38 }
 0x250   :  { %v1215_v45 = vadd.f32 %v1501_v28, %v2874_v13 }
 0x252   :  { %v1360_v46 = vadd.f32 %v1581_v58, %v1215_v45 }
 0x254   :  { %1426 = vst [vmem:[#allocation8 + $0x18] sm:$0xff] %v1360_v46 }
 0x257   :  { %v1502_v7 = vpop.f32.mrb[40].mxu0 }
 0x258   :  { %v1582_v11 = vpop.f32.mrb[40].mxu1  ;;  %v1503_v0 = vpop.f32.mrb[41].mxu0 }
 0x259   :  { %v1504_v18 = vadd.f32 %v1503_v0, %v1502_v7  ;;  %v1583_v21 = vpop.f32.mrb[41].mxu1 }
 0x25a   :  { %v1584_v51 = vadd.f32 %v1583_v21, %v1582_v11 }
 0x25b   :  { %v1220_v25 = vadd.f32 %v1504_v18, %v2874_v13 }
 0x25d   :  { %v1365_v3 = vadd.f32 %v1584_v51, %v1220_v25 }
 0x25f   :  { %1427 = vst [vmem:[#allocation8 + $0x20] sm:$0xff] %v1365_v3 }
 0x261   :  { %v1505_v6 = vpop.f32.mrb[42].mxu0 }
 0x262   :  { %v1585_v23 = vpop.f32.mrb[42].mxu1  ;;  %v1506_v55 = vpop.f32.mrb[43].mxu0 }
 0x263   :  { %v1507_v37 = vadd.f32 %v1506_v55, %v1505_v6  ;;  %v1586_v34 = vpop.f32.mrb[43].mxu1 }
 0x264   :  { %v1587_v62 = vadd.f32 %v1586_v34, %v1585_v23 }
 0x265   :  { %v1225_v12 = vadd.f32 %v1507_v37, %v2874_v13 }
 0x267   :  { %v1370_v47 = vadd.f32 %v1587_v62, %v1225_v12 }
 0x269   :  { %1428 = vst [vmem:[#allocation8 + $0x28] sm:$0xff] %v1370_v47 }
 0x26a   :  { %v1508_v31 = vpop.f32.mrb[44].mxu0 }
 0x26b   :  { %v1509_v33 = vpop.f32.mrb[45].mxu0 }
 0x26c   :  { %v1588_v27 = vpop.f32.mrb[44].mxu1  ;;  %v1510_v17 = vadd.f32 %v1509_v33, %v1508_v31 }
 0x26d   :  { %v1589_v10 = vpop.f32.mrb[45].mxu1 }
 0x26e   :  { %v1590_v48 = vadd.f32 %v1589_v10, %v1588_v27  ;;  %v1230_v30 = vadd.f32 %v1510_v17, %v2874_v13 }
 0x270   :  { %v1375_v60 = vadd.f32 %v1590_v48, %v1230_v30 }
 0x272   :  { %1429 = vst [vmem:[#allocation8 + $0x30] sm:$0xff] %v1375_v60 }
 0x274   :  { %v1511_v32 = vpop.f32.mrb[46].mxu0 }
 0x275   :  { %v1512_v22 = vpop.f32.mrb[47].mxu0 }
 0x276   :  { %v1591_v40 = vpop.f32.mrb[46].mxu1  ;;  %v1513_v9 = vadd.f32 %v1512_v22, %v1511_v32 }
 0x277   :  { %v1592_v44 = vpop.f32.mrb[47].mxu1 }
 0x278   :  { %v1593_v20 = vadd.f32 %v1592_v44, %v1591_v40  ;;  %v1235_v63 = vadd.f32 %v1513_v9, %v2874_v13 }
 0x27a   :  { %v1380_v1 = vadd.f32 %v1593_v20, %v1235_v63 }
 0x27c   :  { %1430 = vst [vmem:[#allocation8 + $0x38] sm:$0xff] %v1380_v1 }
 0x27f   :  { %v1514_v19 = vpop.f32.mrb[48].mxu0 }
 0x280   :  { %v1594_v42 = vpop.f32.mrb[48].mxu1  ;;  %v1515_v43 = vpop.f32.mrb[49].mxu0 }
 0x281   :  { %v1516_v49 = vadd.f32 %v1515_v43, %v1514_v19  ;;  %v1595_v29 = vpop.f32.mrb[49].mxu1 }
 0x282   :  { %v1596_v52 = vadd.f32 %v1595_v29, %v1594_v42 }
 0x283   :  { %v1240_v8 = vadd.f32 %v1516_v49, %v2874_v13  ;;  %v1517_v59 = vpop.f32.mrb[50].mxu0 }
 0x284   :  { %v1518_v15 = vpop.f32.mrb[51].mxu0 }
 0x285   :  { %v1385_v24 = vadd.f32 %v1596_v52, %v1240_v8  ;;  %v1519_v26 = vadd.f32 %v1518_v15, %v1517_v59 }
 0x286   :  { %v1597_v41 = vpop.f32.mrb[50].mxu1 }
 0x287   :  { %1431 = vst [vmem:[#allocation8 + $0x40] sm:$0xff] %v1385_v24  ;;  %v1245_v61 = vadd.f32 %v1519_v26, %v2874_v13  ;;  %v1598_v14 = vpop.f32.mrb[51].mxu1 }
 0x288   :  { %v1599_v36 = vadd.f32 %v1598_v14, %v1597_v41 }
 0x28a   :  { %v1390_v50 = vadd.f32 %v1599_v36, %v1245_v61 }
 0x28b   :  { %v1520_v4 = vpop.f32.mrb[52].mxu0 }
 0x28c   :  { %1432 = vst [vmem:[#allocation8 + $0x48] sm:$0xff] %v1390_v50  ;;  %v1600_v39 = vpop.f32.mrb[52].mxu1  ;;  %v1521_v5 = vpop.f32.mrb[53].mxu0 }
 0x28d   :  { %v1522_v16 = vadd.f32 %v1521_v5, %v1520_v4  ;;  %v1601_v35 = vpop.f32.mrb[53].mxu1 }
 0x28e   :  { %v1602_v53 = vadd.f32 %v1601_v35, %v1600_v39 }
 0x28f   :  { %v1250_v2 = vadd.f32 %v1522_v16, %v2874_v13 }
 0x291   :  { %v1395_v54 = vadd.f32 %v1602_v53, %v1250_v2 }
 0x292   :  { %v1523_v38 = vpop.f32.mrb[54].mxu0 }
 0x293   :  { %1433 = vst [vmem:[#allocation8 + $0x50] sm:$0xff] %v1395_v54  ;;  %v1524_v56 = vpop.f32.mrb[55].mxu0 }
 0x294   :  { %v1525_v57 = vadd.f32 %v1524_v56, %v1523_v38 }
 0x295   :  { %v1603_v28 = vpop.f32.mrb[54].mxu1 }
 0x296   :  { %v1604_v58 = vpop.f32.mrb[55].mxu1  ;;  %v1255_v45 = vadd.f32 %v1525_v57, %v2874_v13 }
 0x297   :  { %v1605_v46 = vadd.f32 %v1604_v58, %v1603_v28 }
 0x298   :  { %v1526_v7 = vpop.f32.mrb[56].mxu0 }
 0x299   :  { %v1400_v11 = vadd.f32 %v1605_v46, %v1255_v45  ;;  %v1606_v0 = vpop.f32.mrb[56].mxu1  ;;  %v1527_v18 = vpop.f32.mrb[57].mxu0 }
 0x29a   :  { %v1528_v21 = vadd.f32 %v1527_v18, %v1526_v7  ;;  %v1607_v51 = vpop.f32.mrb[57].mxu1 }
 0x29b   :  { %1434 = vst [vmem:[#allocation8 + $0x58] sm:$0xff] %v1400_v11  ;;  %v1608_v25 = vadd.f32 %v1607_v51, %v1606_v0 }
 0x29c   :  { %v1260_v3 = vadd.f32 %v1528_v21, %v2874_v13 }
 0x29e   :  { %v1405_v6 = vadd.f32 %v1608_v25, %v1260_v3 }
 0x2a0   :  { %1435 = vst [vmem:[#allocation8 + $0x60] sm:$0xff] %v1405_v6 }
 0x2a1   :  { %v1529_v23 = vpop.f32.mrb[58].mxu0 }
 0x2a2   :  { %v1609_v55 = vpop.f32.mrb[58].mxu1  ;;  %v1530_v37 = vpop.f32.mrb[59].mxu0 }
 0x2a3   :  { %v1531_v34 = vadd.f32 %v1530_v37, %v1529_v23  ;;  %v1610_v62 = vpop.f32.mrb[59].mxu1 }
 0x2a4   :  { %v1611_v12 = vadd.f32 %v1610_v62, %v1609_v55 }
 0x2a5   :  { %v1265_v47 = vadd.f32 %v1531_v34, %v2874_v13  ;;  %v1532_v27 = vpop.f32.mrb[60].mxu0 }
 0x2a6   :  { %v1533_v33 = vpop.f32.mrb[61].mxu0 }
 0x2a7   :  { %v1410_v31 = vadd.f32 %v1611_v12, %v1265_v47  ;;  %v1534_v17 = vadd.f32 %v1533_v33, %v1532_v27 }
 0x2a9   :  { %1436 = vst [vmem:[#allocation8 + $0x68] sm:$0xff] %v1410_v31  ;;  %v1612_v10 = vpop.f32.mrb[60].mxu1  ;;  %v1270_v48 = vadd.f32 %v1534_v17, %v2874_v13 }
 0x2aa   :  { %v1613_v30 = vpop.f32.mrb[61].mxu1 }
 0x2ab   :  { %v1614_v60 = vadd.f32 %v1613_v30, %v1612_v10 }
 0x2ac   :  { %v1535_v32 = vpop.f32.mrb[62].mxu0 }
 0x2ad   :  { %v1415_v40 = vadd.f32 %v1614_v60, %v1270_v48  ;;  %v1615_v22 = vpop.f32.mrb[62].mxu1  ;;  %v1536_v9 = vpop.f32.mrb[63].mxu0 }
 0x2ae   :  { %v1537_v44 = vadd.f32 %v1536_v9, %v1535_v32  ;;  %v1616_v20 = vpop.f32.mrb[63].mxu1 }
 0x2af   :  { %1437 = vst [vmem:[#allocation8 + $0x70] sm:$0xff] %v1415_v40  ;;  %v1617_v63 = vadd.f32 %v1616_v20, %v1615_v22 }
 0x2b0   :  { %v1275_v1 = vadd.f32 %v1537_v44, %v2874_v13 }
 0x2b2   :  { %v1420_v19 = vadd.f32 %v1617_v63, %v1275_v1 }
 0x2b4   :  { %1438 = vst [vmem:[#allocation8 + $0x78] sm:$0xff] %v1420_v19 }
 0x2b5   :  { %1960 = shalt.err (!%p1957_p0)
}
 0x2b6   :  { %s1961_s12 = scalar_lea.hbm %s2912_s5, 2048 }
 0x2b7   :  { %p1962_p1 = scmp.ne.s32.totalorder %s2912_s5, %s1961_s12  ;;  %p1965_p2 = scmp.lt.u32.totalorder %s1961_s12, %s2912_s5 }
 0x2b9   :  { %p1967_p3 = pnand %p1965_p2, %p1962_p1 }
 0x2bb   :  { %1970 = shalt.err (!%p1967_p3)
}
 0x2bc   :  { %1450 = dma.vmem_to_hbm [thread:$0]  %s1445_s8, 2048, %s2912_s5, [#allocation4], %s1981_s1, %s1981_s1, %s1982_s17  }
 0x2bd   :  { %1975 = dma.done.wait [#allocation4], 2048  }
 0x2be   :  { %1976 = vsyncadd [#allocation4], 4294965248 }
 0x2bf   :  { %1454 = vsyncpa [#allocation3], 1 }
 0x2c0   :  { %1455 = vsyncpa [#allocation6], 1 }
 0x2c1   :  { %1456 = vsyncpa [#allocation4], 1 }

</bundles_post_ra>
